<compile_context>
chip_gen: v6e
topology: v6e:2x2x1
jax: 0.10.0
libtpu: 0.0.40
codegen_flags: <defaults>
</compile_context>

<pallas_src>
import functools

import jax
import jax.numpy as jnp
from jax import lax
from jax.experimental import pallas as pl
from jax.experimental.pallas import tpu as pltpu

# ----------------------- small, module-consistent config ---------------------
TOKEN_SIZE = 8                 # tokenizer token_size
STRIDES = [1, 2]               # tokenizer strides (small version of [1, 2, 6])
GRID_SIZES = [2, 2]            # tokenizer grid_sizes (small version of [2, 3, 3])
HEIGHT, WIDTH = 32, 32         # small version of 288 x 288
IMG_CH = 3

EMBED_DIM = 32                 # small version of ViT-B's 768
DEPTH = 2                      # small version of 12 blocks
NUM_HEADS = 4
MLP_RATIO = 4
NUM_REG = 4                    # register tokens produced by the backbone
LN_EPS = 1e-6
NEG_INF = -1e9
SUBLANE = 8


# =============================== tokenizer (glue) =============================
# TODO(synk): the exact interpolation / padding policy of FoveatedImageTokenizer
# is not specified in the provided source; strided nearest sampling with zero
# padding outside the image and an "any in-bounds pixel" token mask is used.
def tokenize(x, centers):
    """x: [B, 3, H, W] NCHW, centers: [B, 2] normalized (x, y) in [-1, 1].

    Returns (tokens [B, N, 3*ts*ts] float32, masks [B, N] bool)."""
    B, C, H, W = x.shape
    cx = (centers[:, 0] + 1.0) * 0.5 * (W - 1)
    cy = (centers[:, 1] + 1.0) * 0.5 * (H - 1)

    tok_list, mask_list = [], []
    for stride, g in zip(STRIDES, GRID_SIZES):
        side = TOKEN_SIZE * g
        offs = (jnp.arange(side, dtype=jnp.float32) - (side - 1) / 2.0) * stride
        px = jnp.round(cx[:, None] + offs[None, :]).astype(jnp.int32)   # [B, side]
        py = jnp.round(cy[:, None] + offs[None, :]).astype(jnp.int32)   # [B, side]
        vx = (px >= 0) & (px < W)
        vy = (py >= 0) & (py < H)
        pxc = jnp.clip(px, 0, W - 1)
        pyc = jnp.clip(py, 0, H - 1)

        bidx = jnp.arange(B)[:, None, None, None]
        cidx = jnp.arange(C)[None, :, None, None]
        patch = x[bidx, cidx, pyc[:, None, :, None], pxc[:, None, None, :]]  # [B,C,side,side]
        valid = vy[:, :, None] & vx[:, None, :]                              # [B,side,side]
        patch = patch * valid[:, None, :, :].astype(x.dtype)

        # split the (side x side) crop into g*g tokens of (ts x ts)
        patch = patch.reshape(B, C, g, TOKEN_SIZE, g, TOKEN_SIZE)
        patch = patch.transpose(0, 2, 4, 1, 3, 5).reshape(B, g * g, C * TOKEN_SIZE * TOKEN_SIZE)
        vtok = valid.reshape(B, g, TOKEN_SIZE, g, TOKEN_SIZE)
        vtok = vtok.transpose(0, 1, 3, 2, 4).reshape(B, g * g, -1)
        tok_list.append(patch.astype(jnp.float32))
        mask_list.append(jnp.any(vtok, axis=-1))

    return jnp.concatenate(tok_list, axis=1), jnp.concatenate(mask_list, axis=1)


# ============================== kernel helpers ================================
def _layer_norm(v, g, b):
    mu = jnp.mean(v, axis=-1, keepdims=True)
    var = jnp.mean(jnp.square(v - mu), axis=-1, keepdims=True)
    return (v - mu) * jax.lax.rsqrt(var + LN_EPS) * g + b


def _gelu(v):
    # TODO(synk): PyTorch nn.GELU default is the exact erf form; the tanh
    # approximation is used for robust Mosaic lowering (EUP tanh).
    c = jnp.float32(0.7978845608028654)  # sqrt(2/pi)
    return 0.5 * v * (1.0 + jnp.tanh(c * (v + 0.044715 * v * v * v)))


# ================================ Pallas kernel ===============================
def backbone_kernel(tok_ref, pos_ref, reg_ref, pw_ref, pb_ref, bias_ref,
                    ln1g_ref, ln1b_ref, wq_ref, bq_ref, wk_ref, bk_ref,
                    wv_ref, bv_ref, wproj_ref, bproj_ref,
                    ln2g_ref, ln2b_ref, w1_ref, b1_ref, w2_ref, b2_ref,
                    fg_ref, fb_ref,
                    o_ref, x_sc,
                    *, num_heads, batch, n_tok, num_reg, n_pad, depth):
    """One grid step == one transformer block over the whole [M, D] slab.
    d == 0 additionally runs the patch-embed / pos-embed / register-token
    assembly; d == depth-1 additionally runs the final LayerNorm."""
    d = pl.program_id(0)
    M, D = x_sc.shape

    # -------- d == 0 prologue: build the resident activation in VMEM --------
    @pl.when(d == 0)
    def _():
        reg = reg_ref[...]                                            # [num_reg, D]
        # patch embedding (bf16 weights, f32 accumulation)
        emb = jnp.dot(tok_ref[...].astype(jnp.bfloat16), pw_ref[...],
                      preferred_element_type=jnp.float32) + pb_ref[...]   # [B*N, D]
        pos = pos_ref[...]                                            # [n_tok, D]
        # TODO(synk): positional embedding is added to patch tokens only (not to
        # register tokens); verify against the reference backbone's policy.
        for b in range(batch):      # prologue-only loop; full-lane-width stores
            x_sc[pl.ds(b * num_reg, num_reg), :] = reg
        for b in range(batch):
            x_sc[pl.ds(batch * num_reg + b * n_tok, n_tok), :] = (
                emb[b * n_tok:(b + 1) * n_tok, :] + pos)
        if n_pad > 0:
            x_sc[pl.ds(batch * (num_reg + n_tok), n_pad), :] = jnp.zeros(
                (n_pad, D), jnp.float32)

    x = x_sc[...]                                   # [M, D] f32 residual stream
    bias = bias_ref[...]                            # [M, M] block-diag + key-pad mask

    # ---------------- masked multi-head self-attention ----------------
    xn = _layer_norm(x, ln1g_ref[0], ln1b_ref[0]).astype(jnp.bfloat16)
    heads = []
    for h in range(num_heads):
        # per-head weights selected by a LEADING ref index -> no activation
        # lane slices; scale 1/sqrt(dh) already folded into w_q / b_q.
        qh = jnp.dot(xn, wq_ref[0, h], preferred_element_type=jnp.float32) + bq_ref[0, h]
        kh = jnp.dot(xn, wk_ref[0, h], preferred_element_type=jnp.float32) + bk_ref[0, h]
        vh = jnp.dot(xn, wv_ref[0, h], preferred_element_type=jnp.float32) + bv_ref[0, h]
        # scores over the whole slab (lane-dense), no explicit transpose:
        s = lax.dot_general(qh, kh, (((1,), (1,)), ((), ())),
                            preferred_element_type=jnp.float32) + bias   # [M, M]
        s = s - jnp.max(s, axis=-1, keepdims=True)
        p = jnp.exp(s)
        p = p * pl.reciprocal(jnp.sum(p, axis=-1, keepdims=True), approx=True)
        heads.append(jnp.dot(p, vh, preferred_element_type=jnp.float32))  # [M, dh]
    attn = jnp.concatenate(heads, axis=-1)          # single full-width [M, D] value
    x = x + jnp.dot(attn.astype(jnp.bfloat16), wproj_ref[0],
                    preferred_element_type=jnp.float32) + bproj_ref[0]

    # ---------------- MLP ----------------
    xn2 = _layer_norm(x, ln2g_ref[0], ln2b_ref[0]).astype(jnp.bfloat16)
    h1 = _gelu(jnp.dot(xn2, w1_ref[0], preferred_element_type=jnp.float32) + b1_ref[0])
    x = x + jnp.dot(h1.astype(jnp.bfloat16), w2_ref[0],
                    preferred_element_type=jnp.float32) + b2_ref[0]

    x_sc[...] = x

    @pl.when(d == depth - 1)
    def _():
        o_ref[...] = _layer_norm(x, fg_ref[...], fb_ref[...])


# ============================== Pallas wrapper ================================
def run_backbone(tokens_flat, attn_bias, params, *, batch, n_tok, n_pad):
    """Fused: patch-embed prologue + all transformer blocks + final LayerNorm."""
    blocks = params['blocks']
    M = attn_bias.shape[0]
    depth, D, _ = blocks['w_qkv'].shape
    H = NUM_HEADS
    dh = D // H
    scale = 1.0 / float(dh) ** 0.5
    bf16 = jnp.bfloat16

    def heads_w(w):   # [depth, D, D] -> [depth, H, D, dh]   (head on a leading axis)
        return w.reshape(depth, D, H, dh).transpose(0, 2, 1, 3)

    def heads_b(b):   # [depth, 1, D] -> [depth, H, 1, dh]
        return b.reshape(depth, 1, H, dh).transpose(0, 2, 1, 3)

    wqkv, bqkv = blocks['w_qkv'], blocks['b_qkv']
    # fold 1/sqrt(dh) into the q projection; stream matmul weights as bf16.
    w_q = heads_w(wqkv[:, :, :D] * scale).astype(bf16)
    w_k = heads_w(wqkv[:, :, D:2 * D]).astype(bf16)
    w_v = heads_w(wqkv[:, :, 2 * D:]).astype(bf16)
    b_q = heads_b(bqkv[:, :, :D] * scale)
    b_k = heads_b(bqkv[:, :, D:2 * D])
    b_v = heads_b(bqkv[:, :, 2 * D:])

    weights = [blocks['ln1_g'], blocks['ln1_b'],
               w_q, b_q, w_k, b_k, w_v, b_v,
               blocks['w_proj'].astype(bf16), blocks['b_proj'],
               blocks['ln2_g'], blocks['ln2_b'],
               blocks['w_mlp1'].astype(bf16), blocks['b_mlp1'],
               blocks['w_mlp2'].astype(bf16), blocks['b_mlp2']]

    consts = [tokens_flat, params['pos_embed'], params['reg_tokens'],
              params['patch_w'].astype(bf16), params['patch_b'], attn_bias]

    def const_spec(a):
        return pl.BlockSpec(a.shape, lambda d: (0,) * a.ndim)

    def stacked_spec(a):
        # [depth, ...] -> one layer per grid step; pipeline prefetches layer d+1
        return pl.BlockSpec((1,) + a.shape[1:], lambda d: (d,) + (0,) * (a.ndim - 1))

    kernel = functools.partial(
        backbone_kernel, num_heads=H, batch=batch, n_tok=n_tok,
        num_reg=NUM_REG, n_pad=n_pad, depth=depth)

    return pl.pallas_call(
        kernel,
        out_shape=jax.ShapeDtypeStruct((M, D), jnp.float32),
        grid=(depth,),
        in_specs=[const_spec(a) for a in consts]
                 + [stacked_spec(w) for w in weights]
                 + [const_spec(params['final_ln_g']), const_spec(params['final_ln_b'])],
        out_specs=pl.BlockSpec((M, D), lambda d: (0, 0)),
        scratch_shapes=[pltpu.VMEM((M, D), jnp.float32)],   # resident activation
        compiler_params=pltpu.CompilerParams(
            dimension_semantics=("arbitrary",),              # depth carries state
            vmem_limit_bytes=48 * 1024 * 1024),
    )(*consts, *weights, params['final_ln_g'], params['final_ln_b'])


# ============================ parameter construction ==========================
def init_vit_params(key, patch_dim, num_tokens, embed_dim, depth, mlp_ratio, num_reg):
    hidden = embed_dim * mlp_ratio
    ks = jax.random.split(key, 7)

    def nrm(k, shape):
        return (0.02 * jax.random.normal(k, shape)).astype(jnp.float32)

    return {
        'patch_w': nrm(ks[0], (patch_dim, embed_dim)),
        'patch_b': jnp.zeros((1, embed_dim), jnp.float32),
        'pos_embed': nrm(ks[1], (num_tokens, embed_dim)),
        'reg_tokens': nrm(ks[2], (num_reg, embed_dim)),
        'final_ln_g': jnp.ones((1, embed_dim), jnp.float32),
        'final_ln_b': jnp.zeros((1, embed_dim), jnp.float32),
        'blocks': {     # per-layer weights stacked along a leading depth axis
            'ln1_g': jnp.ones((depth, 1, embed_dim), jnp.float32),
            'ln1_b': jnp.zeros((depth, 1, embed_dim), jnp.float32),
            'w_qkv': nrm(ks[3], (depth, embed_dim, 3 * embed_dim)),
            'b_qkv': jnp.zeros((depth, 1, 3 * embed_dim), jnp.float32),
            'w_proj': nrm(ks[4], (depth, embed_dim, embed_dim)),
            'b_proj': jnp.zeros((depth, 1, embed_dim), jnp.float32),
            'ln2_g': jnp.ones((depth, 1, embed_dim), jnp.float32),
            'ln2_b': jnp.zeros((depth, 1, embed_dim), jnp.float32),
            'w_mlp1': nrm(ks[5], (depth, embed_dim, hidden)),
            'b_mlp1': jnp.zeros((depth, 1, hidden), jnp.float32),
            'w_mlp2': nrm(ks[6], (depth, hidden, embed_dim)),
            'b_mlp2': jnp.zeros((depth, 1, embed_dim), jnp.float32),
        },
    }


# ================================ forward pass ================================
def foveated_vit_forward(params, x, centers):
    """Mirrors FoveatedViT.forward: returns (features [B, num_tokens, D], viz)."""
    viz = {}
    # TODO(synk): visualization branch (generate_visualization) is inference-time
    # plotting glue with no kernel equivalent; omitted.
    tokens, masks = tokenize(x, centers)                       # [B,N,P], [B,N]
    B, N, P = tokens.shape
    D = params['patch_w'].shape[1]

    M_valid = B * (NUM_REG + N)
    M = -(-M_valid // SUBLANE) * SUBLANE                       # pad rows to x8
    n_pad = M - M_valid

    # Row layout of the resident slab: [B*NUM_REG regs | B*N patches | pad].
    # Batch isolation + key-padding are folded into ONE [M, M] additive bias so
    # the in-kernel softmax runs lane-dense over the whole slab.
    row_batch = jnp.concatenate([
        jnp.repeat(jnp.arange(B, dtype=jnp.int32), NUM_REG),
        jnp.repeat(jnp.arange(B, dtype=jnp.int32), N),
        jnp.full((n_pad,), -1, jnp.int32)])
    key_valid = jnp.concatenate([
        jnp.ones((B * NUM_REG,), bool),
        masks.reshape(B * N),
        jnp.zeros((n_pad,), bool)])
    allowed = (row_batch[:, None] == row_batch[None, :]) & key_valid[None, :]
    attn_bias = jnp.where(allowed, 0.0, NEG_INF).astype(jnp.float32)   # [M, M]

    out = run_backbone(tokens.reshape(B * N, P), attn_bias, params,
                       batch=B, n_tok=N, n_pad=n_pad)          # [M, D]

    reg_tokens = out[:B * NUM_REG].reshape(B, NUM_REG, D)      # noqa: F841 (backbone aux output)
    features = out[B * NUM_REG:B * NUM_REG + B * N].reshape(B, N, D)
    assert features.shape[1] == N, f'Expected {N} tokens, got {features.shape[1]}'
    return features, viz


# ==================================== main ====================================
if __name__ == "__main__":
    key = jax.random.PRNGKey(0)
    kx, kp = jax.random.split(key)

    B = 2
    x = jax.random.normal(kx, (B, IMG_CH, HEIGHT, WIDTH), jnp.float32)
    centers = jnp.zeros((B, 2), jnp.float32)

    num_tokens = sum(g * g for g in GRID_SIZES)
    patch_dim = IMG_CH * TOKEN_SIZE * TOKEN_SIZE
    params = init_vit_params(kp, patch_dim, num_tokens, EMBED_DIM, DEPTH, MLP_RATIO, NUM_REG)

    fwd = jax.jit(foveated_vit_forward)
    features, viz = fwd(params, x, centers)
    features = jax.block_until_ready(features)

    assert features.shape == (B, num_tokens, EMBED_DIM), features.shape
    assert features.dtype == jnp.float32
    print("KERNEL_OK")
</pallas_src>

<mosaic_0001>
module attributes {stable_mosaic.version = 11 : i64} {
  func.func @backbone_kernel(%arg0: i32, %arg1: memref<16x192xf32, #tpu.memory_space<vmem>>, %arg2: memref<8x32xf32, #tpu.memory_space<vmem>>, %arg3: memref<4x32xf32, #tpu.memory_space<vmem>>, %arg4: memref<192x32xbf16, #tpu.memory_space<vmem>>, %arg5: memref<1x32xf32, #tpu.memory_space<vmem>>, %arg6: memref<24x24xf32, #tpu.memory_space<vmem>>, %arg7: memref<1x1x32xf32, #tpu.memory_space<vmem>>, %arg8: memref<1x1x32xf32, #tpu.memory_space<vmem>>, %arg9: memref<1x4x32x8xbf16, #tpu.memory_space<vmem>>, %arg10: memref<1x4x1x8xf32, #tpu.memory_space<vmem>>, %arg11: memref<1x4x32x8xbf16, #tpu.memory_space<vmem>>, %arg12: memref<1x4x1x8xf32, #tpu.memory_space<vmem>>, %arg13: memref<1x4x32x8xbf16, #tpu.memory_space<vmem>>, %arg14: memref<1x4x1x8xf32, #tpu.memory_space<vmem>>, %arg15: memref<1x32x32xbf16, #tpu.memory_space<vmem>>, %arg16: memref<1x1x32xf32, #tpu.memory_space<vmem>>, %arg17: memref<1x1x32xf32, #tpu.memory_space<vmem>>, %arg18: memref<1x1x32xf32, #tpu.memory_space<vmem>>, %arg19: memref<1x32x128xbf16, #tpu.memory_space<vmem>>, %arg20: memref<1x1x128xf32, #tpu.memory_space<vmem>>, %arg21: memref<1x128x32xbf16, #tpu.memory_space<vmem>>, %arg22: memref<1x1x32xf32, #tpu.memory_space<vmem>>, %arg23: memref<1x32xf32, #tpu.memory_space<vmem>>, %arg24: memref<1x32xf32, #tpu.memory_space<vmem>>, %arg25: memref<24x32xf32, #tpu.memory_space<vmem>>, %arg26: memref<24x32xf32, #tpu.memory_space<vmem>>) attributes {dimension_semantics = [#tpu.dimension_semantics<arbitrary>], iteration_bounds = array<i64: 2>, scalar_prefetch = 0 : i64, scratch_operands = 1 : i64, tpu.core_type = #tpu.core_type<tc>, window_params = [{pipeline_mode = #tpu.pipeline_mode<synchronous>, transform_indices = @transform_0, window_bounds = array<i64: 16, 192>}, {pipeline_mode = #tpu.pipeline_mode<synchronous>, transform_indices = @transform_1, window_bounds = array<i64: 8, 32>}, {pipeline_mode = #tpu.pipeline_mode<synchronous>, transform_indices = @transform_2, window_bounds = array<i64: 4, 32>}, {pipeline_mode = #tpu.pipeline_mode<synchronous>, transform_indices = @transform_3, window_bounds = array<i64: 192, 32>}, {pipeline_mode = #tpu.pipeline_mode<synchronous>, transform_indices = @transform_4, window_bounds = array<i64: 1, 32>}, {pipeline_mode = #tpu.pipeline_mode<synchronous>, transform_indices = @transform_5, window_bounds = array<i64: 24, 24>}, {transform_indices = @transform_6, window_bounds = array<i64: 1, 1, 32>}, {transform_indices = @transform_7, window_bounds = array<i64: 1, 1, 32>}, {transform_indices = @transform_8, window_bounds = array<i64: 1, 4, 32, 8>}, {transform_indices = @transform_9, window_bounds = array<i64: 1, 4, 1, 8>}, {transform_indices = @transform_10, window_bounds = array<i64: 1, 4, 32, 8>}, {transform_indices = @transform_11, window_bounds = array<i64: 1, 4, 1, 8>}, {transform_indices = @transform_12, window_bounds = array<i64: 1, 4, 32, 8>}, {transform_indices = @transform_13, window_bounds = array<i64: 1, 4, 1, 8>}, {transform_indices = @transform_14, window_bounds = array<i64: 1, 32, 32>}, {transform_indices = @transform_15, window_bounds = array<i64: 1, 1, 32>}, {transform_indices = @transform_16, window_bounds = array<i64: 1, 1, 32>}, {transform_indices = @transform_17, window_bounds = array<i64: 1, 1, 32>}, {transform_indices = @transform_18, window_bounds = array<i64: 1, 32, 128>}, {transform_indices = @transform_19, window_bounds = array<i64: 1, 1, 128>}, {transform_indices = @transform_20, window_bounds = array<i64: 1, 128, 32>}, {transform_indices = @transform_21, window_bounds = array<i64: 1, 1, 32>}, {pipeline_mode = #tpu.pipeline_mode<synchronous>, transform_indices = @transform_22, window_bounds = array<i64: 1, 32>}, {pipeline_mode = #tpu.pipeline_mode<synchronous>, transform_indices = @transform_23, window_bounds = array<i64: 1, 32>}, {pipeline_mode = #tpu.pipeline_mode<synchronous>, transform_indices = @transform_24, window_bounds = array<i64: 24, 32>}]} {
    %c0_i32 = arith.constant 0 : i32
    %0 = arith.cmpi eq, %arg0, %c0_i32 : i32
    %1 = arith.extui %0 : i1 to i32
    %c0_i32_0 = arith.constant 0 : i32
    %2 = arith.cmpi ne, %1, %c0_i32_0 : i32
    scf.if %2 {
      %c0_174 = arith.constant 0 : index
      %c0_175 = arith.constant 0 : index
      %238 = vector.load %arg3[%c0_174, %c0_175] : memref<4x32xf32, #tpu.memory_space<vmem>>, vector<4x32xf32>
      %c0_176 = arith.constant 0 : index
      %c0_177 = arith.constant 0 : index
      %239 = vector.load %arg1[%c0_176, %c0_177] : memref<16x192xf32, #tpu.memory_space<vmem>>, vector<16x192xf32>
      %240 = arith.truncf %239 : vector<16x192xf32> to vector<16x192xbf16>
      %c0_178 = arith.constant 0 : index
      %c0_179 = arith.constant 0 : index
      %241 = vector.load %arg4[%c0_178, %c0_179] : memref<192x32xbf16, #tpu.memory_space<vmem>>, vector<192x32xbf16>
      %cst_180 = arith.constant dense<0.000000e+00> : vector<16x32xf32>
      %242 = tpu.matmul %240, %241, %cst_180 {dimension_numbers = #tpu.dot_dimension_numbers<[1], [0], [0], [1], [0, 0, 1, 1], [], []>} : vector<16x192xbf16>, vector<192x32xbf16>, vector<16x32xf32> -> vector<16x32xf32>
      %c0_181 = arith.constant 0 : index
      %c0_182 = arith.constant 0 : index
      %243 = vector.load %arg5[%c0_181, %c0_182] : memref<1x32xf32, #tpu.memory_space<vmem>>, vector<1x32xf32>
      %244 = vector.broadcast %243 : vector<1x32xf32> to vector<16x32xf32>
      %245 = arith.addf %242, %244 : vector<16x32xf32>
      %c0_183 = arith.constant 0 : index
      %c0_184 = arith.constant 0 : index
      %246 = vector.load %arg2[%c0_183, %c0_184] : memref<8x32xf32, #tpu.memory_space<vmem>>, vector<8x32xf32>
      %c0_185 = arith.constant 0 : index
      %c0_186 = arith.constant 0 : index
      %247 = vector.load %arg26[%c0_185, %c0_186] : memref<24x32xf32, #tpu.memory_space<vmem>>, vector<4x32xf32>
      tpu.vector_store %arg26[%c0_185, %c0_186], %238 {strides = array<i32>} : memref<24x32xf32, #tpu.memory_space<vmem>>, vector<4x32xf32>,
      %c4 = arith.constant 4 : index
      %c0_187 = arith.constant 0 : index
      %248 = vector.load %arg26[%c4, %c0_187] : memref<24x32xf32, #tpu.memory_space<vmem>>, vector<4x32xf32>
      tpu.vector_store %arg26[%c4, %c0_187], %238 {strides = array<i32>} : memref<24x32xf32, #tpu.memory_space<vmem>>, vector<4x32xf32>,
      %249 = vector.extract_strided_slice %245 {offsets = [0, 0], sizes = [8, 32], strides = [1, 1]} : vector<16x32xf32> to vector<8x32xf32>
      %250 = arith.addf %249, %246 : vector<8x32xf32>
      %c8 = arith.constant 8 : index
      %c0_188 = arith.constant 0 : index
      %251 = vector.load %arg26[%c8, %c0_188] : memref<24x32xf32, #tpu.memory_space<vmem>>, vector<8x32xf32>
      tpu.vector_store %arg26[%c8, %c0_188], %250 {strides = array<i32>} : memref<24x32xf32, #tpu.memory_space<vmem>>, vector<8x32xf32>,
      %252 = vector.extract_strided_slice %245 {offsets = [8, 0], sizes = [8, 32], strides = [1, 1]} : vector<16x32xf32> to vector<8x32xf32>
      %253 = arith.addf %252, %246 : vector<8x32xf32>
      %c16 = arith.constant 16 : index
      %c0_189 = arith.constant 0 : index
      %254 = vector.load %arg26[%c16, %c0_189] : memref<24x32xf32, #tpu.memory_space<vmem>>, vector<8x32xf32>
      tpu.vector_store %arg26[%c16, %c0_189], %253 {strides = array<i32>} : memref<24x32xf32, #tpu.memory_space<vmem>>, vector<8x32xf32>,
    } else {
    }
    %c0 = arith.constant 0 : index
    %c0_1 = arith.constant 0 : index
    %3 = vector.load %arg26[%c0, %c0_1] : memref<24x32xf32, #tpu.memory_space<vmem>>, vector<24x32xf32>
    %c0_2 = arith.constant 0 : index
    %c0_3 = arith.constant 0 : index
    %4 = vector.load %arg6[%c0_2, %c0_3] : memref<24x24xf32, #tpu.memory_space<vmem>>, vector<24x24xf32>
    %c0_4 = arith.constant 0 : index
    %c0_5 = arith.constant 0 : index
    %c0_6 = arith.constant 0 : index
    %5 = vector.load %arg7[%c0_4, %c0_5, %c0_6] : memref<1x1x32xf32, #tpu.memory_space<vmem>>, vector<1x1x32xf32>
    %6 = vector.shape_cast %5 : vector<1x1x32xf32> to vector<1x32xf32>
    %c0_7 = arith.constant 0 : index
    %c0_8 = arith.constant 0 : index
    %c0_9 = arith.constant 0 : index
    %7 = vector.load %arg8[%c0_7, %c0_8, %c0_9] : memref<1x1x32xf32, #tpu.memory_space<vmem>>, vector<1x1x32xf32>
    %8 = vector.shape_cast %7 : vector<1x1x32xf32> to vector<1x32xf32>
    %cst = arith.constant dense<0.000000e+00> : vector<24xf32>
    %9 = vector.multi_reduction <add>, %3, %cst [1] : vector<24x32xf32> to vector<24xf32>
    %10 = vector.shape_cast %9 : vector<24xf32> to vector<24x1xf32>
    %cst_10 = arith.constant 3.200000e+01 : f32
    %11 = vector.broadcast %cst_10 : f32 to vector<24x1xf32>
    %12 = arith.divf %10, %11 : vector<24x1xf32>
    %13 = vector.broadcast %12 : vector<24x1xf32> to vector<24x32xf32>
    %14 = arith.subf %3, %13 : vector<24x32xf32>
    %15 = arith.mulf %14, %14 : vector<24x32xf32>
    %cst_11 = arith.constant dense<0.000000e+00> : vector<24xf32>
    %16 = vector.multi_reduction <add>, %15, %cst_11 [1] : vector<24x32xf32> to vector<24xf32>
    %17 = vector.shape_cast %16 : vector<24xf32> to vector<24x1xf32>
    %cst_12 = arith.constant 3.200000e+01 : f32
    %18 = vector.broadcast %cst_12 : f32 to vector<24x1xf32>
    %19 = arith.divf %17, %18 : vector<24x1xf32>
    %20 = vector.broadcast %12 : vector<24x1xf32> to vector<24x32xf32>
    %21 = arith.subf %3, %20 : vector<24x32xf32>
    %cst_13 = arith.constant 9.99999997E-7 : f32
    %22 = vector.broadcast %cst_13 : f32 to vector<24x1xf32>
    %23 = arith.addf %19, %22 : vector<24x1xf32>
    %24 = math.rsqrt %23 : vector<24x1xf32>
    %25 = vector.broadcast %24 : vector<24x1xf32> to vector<24x32xf32>
    %26 = arith.mulf %21, %25 : vector<24x32xf32>
    %27 = vector.broadcast %6 : vector<1x32xf32> to vector<24x32xf32>
    %28 = arith.mulf %26, %27 : vector<24x32xf32>
    %29 = vector.broadcast %8 : vector<1x32xf32> to vector<24x32xf32>
    %30 = arith.addf %28, %29 : vector<24x32xf32>
    %31 = arith.truncf %30 : vector<24x32xf32> to vector<24x32xbf16>
    %c0_14 = arith.constant 0 : index
    %c0_15 = arith.constant 0 : index
    %c0_16 = arith.constant 0 : index
    %c0_17 = arith.constant 0 : index
    %32 = vector.load %arg9[%c0_14, %c0_15, %c0_16, %c0_17] : memref<1x4x32x8xbf16, #tpu.memory_space<vmem>>, vector<1x1x32x8xbf16>
    %33 = vector.shape_cast %32 : vector<1x1x32x8xbf16> to vector<32x8xbf16>
    %cst_18 = arith.constant dense<0.000000e+00> : vector<24x8xf32>
    %34 = tpu.matmul %31, %33, %cst_18 {dimension_numbers = #tpu.dot_dimension_numbers<[1], [0], [0], [1], [0, 0, 1, 1], [], []>} : vector<24x32xbf16>, vector<32x8xbf16>, vector<24x8xf32> -> vector<24x8xf32>
    %c0_19 = arith.constant 0 : index
    %c0_20 = arith.constant 0 : index
    %c0_21 = arith.constant 0 : index
    %c0_22 = arith.constant 0 : index
    %35 = vector.load %arg10[%c0_19, %c0_20, %c0_21, %c0_22] : memref<1x4x1x8xf32, #tpu.memory_space<vmem>>, vector<1x1x1x8xf32>
    %36 = vector.shape_cast %35 : vector<1x1x1x8xf32> to vector<1x8xf32>
    %37 = vector.broadcast %36 : vector<1x8xf32> to vector<24x8xf32>
    %38 = arith.addf %34, %37 : vector<24x8xf32>
    %c0_23 = arith.constant 0 : index
    %c0_24 = arith.constant 0 : index
    %c0_25 = arith.constant 0 : index
    %c0_26 = arith.constant 0 : index
    %39 = vector.load %arg11[%c0_23, %c0_24, %c0_25, %c0_26] : memref<1x4x32x8xbf16, #tpu.memory_space<vmem>>, vector<1x1x32x8xbf16>
    %40 = vector.shape_cast %39 : vector<1x1x32x8xbf16> to vector<32x8xbf16>
    %cst_27 = arith.constant dense<0.000000e+00> : vector<24x8xf32>
    %41 = tpu.matmul %31, %40, %cst_27 {dimension_numbers = #tpu.dot_dimension_numbers<[1], [0], [0], [1], [0, 0, 1, 1], [], []>} : vector<24x32xbf16>, vector<32x8xbf16>, vector<24x8xf32> -> vector<24x8xf32>
    %c0_28 = arith.constant 0 : index
    %c0_29 = arith.constant 0 : index
    %c0_30 = arith.constant 0 : index
    %c0_31 = arith.constant 0 : index
    %42 = vector.load %arg12[%c0_28, %c0_29, %c0_30, %c0_31] : memref<1x4x1x8xf32, #tpu.memory_space<vmem>>, vector<1x1x1x8xf32>
    %43 = vector.shape_cast %42 : vector<1x1x1x8xf32> to vector<1x8xf32>
    %44 = vector.broadcast %43 : vector<1x8xf32> to vector<24x8xf32>
    %45 = arith.addf %41, %44 : vector<24x8xf32>
    %c0_32 = arith.constant 0 : index
    %c0_33 = arith.constant 0 : index
    %c0_34 = arith.constant 0 : index
    %c0_35 = arith.constant 0 : index
    %46 = vector.load %arg13[%c0_32, %c0_33, %c0_34, %c0_35] : memref<1x4x32x8xbf16, #tpu.memory_space<vmem>>, vector<1x1x32x8xbf16>
    %47 = vector.shape_cast %46 : vector<1x1x32x8xbf16> to vector<32x8xbf16>
    %cst_36 = arith.constant dense<0.000000e+00> : vector<24x8xf32>
    %48 = tpu.matmul %31, %47, %cst_36 {dimension_numbers = #tpu.dot_dimension_numbers<[1], [0], [0], [1], [0, 0, 1, 1], [], []>} : vector<24x32xbf16>, vector<32x8xbf16>, vector<24x8xf32> -> vector<24x8xf32>
    %c0_37 = arith.constant 0 : index
    %c0_38 = arith.constant 0 : index
    %c0_39 = arith.constant 0 : index
    %c0_40 = arith.constant 0 : index
    %49 = vector.load %arg14[%c0_37, %c0_38, %c0_39, %c0_40] : memref<1x4x1x8xf32, #tpu.memory_space<vmem>>, vector<1x1x1x8xf32>
    %50 = vector.shape_cast %49 : vector<1x1x1x8xf32> to vector<1x8xf32>
    %51 = vector.broadcast %50 : vector<1x8xf32> to vector<24x8xf32>
    %52 = arith.addf %48, %51 : vector<24x8xf32>
    %cst_41 = arith.constant dense<0.000000e+00> : vector<24x24xf32>
    %53 = tpu.matmul %38, %45, %cst_41 {dimension_numbers = #tpu.dot_dimension_numbers<[1], [1], [0], [0], [0, 0, 1, 0], [], []>} : vector<24x8xf32>, vector<24x8xf32>, vector<24x24xf32> -> vector<24x24xf32>
    %54 = arith.addf %53, %4 : vector<24x24xf32>
    %cst_42 = arith.constant dense<0xFF800000> : vector<24xf32>
    %55 = vector.multi_reduction <maximumf>, %54, %cst_42 [1] : vector<24x24xf32> to vector<24xf32>
    %56 = vector.shape_cast %55 : vector<24xf32> to vector<24x1xf32>
    %57 = vector.broadcast %56 : vector<24x1xf32> to vector<24x24xf32>
    %58 = arith.subf %54, %57 : vector<24x24xf32>
    %59 = math.exp %58 : vector<24x24xf32>
    %cst_43 = arith.constant dense<0.000000e+00> : vector<24xf32>
    %60 = vector.multi_reduction <add>, %59, %cst_43 [1] : vector<24x24xf32> to vector<24xf32>
    %61 = vector.shape_cast %60 : vector<24xf32> to vector<24x1xf32>
    %62 = tpu.reciprocal %61 {approx = true} : vector<24x1xf32> -> vector<24x1xf32>
    %63 = vector.broadcast %62 : vector<24x1xf32> to vector<24x24xf32>
    %64 = arith.mulf %59, %63 : vector<24x24xf32>
    %cst_44 = arith.constant dense<0.000000e+00> : vector<24x8xf32>
    %65 = tpu.matmul %64, %52, %cst_44 {dimension_numbers = #tpu.dot_dimension_numbers<[1], [0], [0], [1], [0, 0, 1, 1], [], []>} : vector<24x24xf32>, vector<24x8xf32>, vector<24x8xf32> -> vector<24x8xf32>
    %c0_45 = arith.constant 0 : index
    %c1 = arith.constant 1 : index
    %c0_46 = arith.constant 0 : index
    %c0_47 = arith.constant 0 : index
    %66 = vector.load %arg9[%c0_45, %c1, %c0_46, %c0_47] : memref<1x4x32x8xbf16, #tpu.memory_space<vmem>>, vector<1x1x32x8xbf16>
    %67 = vector.shape_cast %66 : vector<1x1x32x8xbf16> to vector<32x8xbf16>
    %cst_48 = arith.constant dense<0.000000e+00> : vector<24x8xf32>
    %68 = tpu.matmul %31, %67, %cst_48 {dimension_numbers = #tpu.dot_dimension_numbers<[1], [0], [0], [1], [0, 0, 1, 1], [], []>} : vector<24x32xbf16>, vector<32x8xbf16>, vector<24x8xf32> -> vector<24x8xf32>
    %c0_49 = arith.constant 0 : index
    %c1_50 = arith.constant 1 : index
    %c0_51 = arith.constant 0 : index
    %c0_52 = arith.constant 0 : index
    %69 = vector.load %arg10[%c0_49, %c1_50, %c0_51, %c0_52] : memref<1x4x1x8xf32, #tpu.memory_space<vmem>>, vector<1x1x1x8xf32>
    %70 = vector.shape_cast %69 : vector<1x1x1x8xf32> to vector<1x8xf32>
    %71 = vector.broadcast %70 : vector<1x8xf32> to vector<24x8xf32>
    %72 = arith.addf %68, %71 : vector<24x8xf32>
    %c0_53 = arith.constant 0 : index
    %c1_54 = arith.constant 1 : index
    %c0_55 = arith.constant 0 : index
    %c0_56 = arith.constant 0 : index
    %73 = vector.load %arg11[%c0_53, %c1_54, %c0_55, %c0_56] : memref<1x4x32x8xbf16, #tpu.memory_space<vmem>>, vector<1x1x32x8xbf16>
    %74 = vector.shape_cast %73 : vector<1x1x32x8xbf16> to vector<32x8xbf16>
    %cst_57 = arith.constant dense<0.000000e+00> : vector<24x8xf32>
    %75 = tpu.matmul %31, %74, %cst_57 {dimension_numbers = #tpu.dot_dimension_numbers<[1], [0], [0], [1], [0, 0, 1, 1], [], []>} : vector<24x32xbf16>, vector<32x8xbf16>, vector<24x8xf32> -> vector<24x8xf32>
    %c0_58 = arith.constant 0 : index
    %c1_59 = arith.constant 1 : index
    %c0_60 = arith.constant 0 : index
    %c0_61 = arith.constant 0 : index
    %76 = vector.load %arg12[%c0_58, %c1_59, %c0_60, %c0_61] : memref<1x4x1x8xf32, #tpu.memory_space<vmem>>, vector<1x1x1x8xf32>
    %77 = vector.shape_cast %76 : vector<1x1x1x8xf32> to vector<1x8xf32>
    %78 = vector.broadcast %77 : vector<1x8xf32> to vector<24x8xf32>
    %79 = arith.addf %75, %78 : vector<24x8xf32>
    %c0_62 = arith.constant 0 : index
    %c1_63 = arith.constant 1 : index
    %c0_64 = arith.constant 0 : index
    %c0_65 = arith.constant 0 : index
    %80 = vector.load %arg13[%c0_62, %c1_63, %c0_64, %c0_65] : memref<1x4x32x8xbf16, #tpu.memory_space<vmem>>, vector<1x1x32x8xbf16>
    %81 = vector.shape_cast %80 : vector<1x1x32x8xbf16> to vector<32x8xbf16>
    %cst_66 = arith.constant dense<0.000000e+00> : vector<24x8xf32>
    %82 = tpu.matmul %31, %81, %cst_66 {dimension_numbers = #tpu.dot_dimension_numbers<[1], [0], [0], [1], [0, 0, 1, 1], [], []>} : vector<24x32xbf16>, vector<32x8xbf16>, vector<24x8xf32> -> vector<24x8xf32>
    %c0_67 = arith.constant 0 : index
    %c1_68 = arith.constant 1 : index
    %c0_69 = arith.constant 0 : index
    %c0_70 = arith.constant 0 : index
    %83 = vector.load %arg14[%c0_67, %c1_68, %c0_69, %c0_70] : memref<1x4x1x8xf32, #tpu.memory_space<vmem>>, vector<1x1x1x8xf32>
    %84 = vector.shape_cast %83 : vector<1x1x1x8xf32> to vector<1x8xf32>
    %85 = vector.broadcast %84 : vector<1x8xf32> to vector<24x8xf32>
    %86 = arith.addf %82, %85 : vector<24x8xf32>
    %cst_71 = arith.constant dense<0.000000e+00> : vector<24x24xf32>
    %87 = tpu.matmul %72, %79, %cst_71 {dimension_numbers = #tpu.dot_dimension_numbers<[1], [1], [0], [0], [0, 0, 1, 0], [], []>} : vector<24x8xf32>, vector<24x8xf32>, vector<24x24xf32> -> vector<24x24xf32>
    %88 = arith.addf %87, %4 : vector<24x24xf32>
    %cst_72 = arith.constant dense<0xFF800000> : vector<24xf32>
    %89 = vector.multi_reduction <maximumf>, %88, %cst_72 [1] : vector<24x24xf32> to vector<24xf32>
    %90 = vector.shape_cast %89 : vector<24xf32> to vector<24x1xf32>
    %91 = vector.broadcast %90 : vector<24x1xf32> to vector<24x24xf32>
    %92 = arith.subf %88, %91 : vector<24x24xf32>
    %93 = math.exp %92 : vector<24x24xf32>
    %cst_73 = arith.constant dense<0.000000e+00> : vector<24xf32>
    %94 = vector.multi_reduction <add>, %93, %cst_73 [1] : vector<24x24xf32> to vector<24xf32>
    %95 = vector.shape_cast %94 : vector<24xf32> to vector<24x1xf32>
    %96 = tpu.reciprocal %95 {approx = true} : vector<24x1xf32> -> vector<24x1xf32>
    %97 = vector.broadcast %96 : vector<24x1xf32> to vector<24x24xf32>
    %98 = arith.mulf %93, %97 : vector<24x24xf32>
    %cst_74 = arith.constant dense<0.000000e+00> : vector<24x8xf32>
    %99 = tpu.matmul %98, %86, %cst_74 {dimension_numbers = #tpu.dot_dimension_numbers<[1], [0], [0], [1], [0, 0, 1, 1], [], []>} : vector<24x24xf32>, vector<24x8xf32>, vector<24x8xf32> -> vector<24x8xf32>
    %c0_75 = arith.constant 0 : index
    %c2 = arith.constant 2 : index
    %c0_76 = arith.constant 0 : index
    %c0_77 = arith.constant 0 : index
    %100 = vector.load %arg9[%c0_75, %c2, %c0_76, %c0_77] : memref<1x4x32x8xbf16, #tpu.memory_space<vmem>>, vector<1x1x32x8xbf16>
    %101 = vector.shape_cast %100 : vector<1x1x32x8xbf16> to vector<32x8xbf16>
    %cst_78 = arith.constant dense<0.000000e+00> : vector<24x8xf32>
    %102 = tpu.matmul %31, %101, %cst_78 {dimension_numbers = #tpu.dot_dimension_numbers<[1], [0], [0], [1], [0, 0, 1, 1], [], []>} : vector<24x32xbf16>, vector<32x8xbf16>, vector<24x8xf32> -> vector<24x8xf32>
    %c0_79 = arith.constant 0 : index
    %c2_80 = arith.constant 2 : index
    %c0_81 = arith.constant 0 : index
    %c0_82 = arith.constant 0 : index
    %103 = vector.load %arg10[%c0_79, %c2_80, %c0_81, %c0_82] : memref<1x4x1x8xf32, #tpu.memory_space<vmem>>, vector<1x1x1x8xf32>
    %104 = vector.shape_cast %103 : vector<1x1x1x8xf32> to vector<1x8xf32>
    %105 = vector.broadcast %104 : vector<1x8xf32> to vector<24x8xf32>
    %106 = arith.addf %102, %105 : vector<24x8xf32>
    %c0_83 = arith.constant 0 : index
    %c2_84 = arith.constant 2 : index
    %c0_85 = arith.constant 0 : index
    %c0_86 = arith.constant 0 : index
    %107 = vector.load %arg11[%c0_83, %c2_84, %c0_85, %c0_86] : memref<1x4x32x8xbf16, #tpu.memory_space<vmem>>, vector<1x1x32x8xbf16>
    %108 = vector.shape_cast %107 : vector<1x1x32x8xbf16> to vector<32x8xbf16>
    %cst_87 = arith.constant dense<0.000000e+00> : vector<24x8xf32>
    %109 = tpu.matmul %31, %108, %cst_87 {dimension_numbers = #tpu.dot_dimension_numbers<[1], [0], [0], [1], [0, 0, 1, 1], [], []>} : vector<24x32xbf16>, vector<32x8xbf16>, vector<24x8xf32> -> vector<24x8xf32>
    %c0_88 = arith.constant 0 : index
    %c2_89 = arith.constant 2 : index
    %c0_90 = arith.constant 0 : index
    %c0_91 = arith.constant 0 : index
    %110 = vector.load %arg12[%c0_88, %c2_89, %c0_90, %c0_91] : memref<1x4x1x8xf32, #tpu.memory_space<vmem>>, vector<1x1x1x8xf32>
    %111 = vector.shape_cast %110 : vector<1x1x1x8xf32> to vector<1x8xf32>
    %112 = vector.broadcast %111 : vector<1x8xf32> to vector<24x8xf32>
    %113 = arith.addf %109, %112 : vector<24x8xf32>
    %c0_92 = arith.constant 0 : index
    %c2_93 = arith.constant 2 : index
    %c0_94 = arith.constant 0 : index
    %c0_95 = arith.constant 0 : index
    %114 = vector.load %arg13[%c0_92, %c2_93, %c0_94, %c0_95] : memref<1x4x32x8xbf16, #tpu.memory_space<vmem>>, vector<1x1x32x8xbf16>
    %115 = vector.shape_cast %114 : vector<1x1x32x8xbf16> to vector<32x8xbf16>
    %cst_96 = arith.constant dense<0.000000e+00> : vector<24x8xf32>
    %116 = tpu.matmul %31, %115, %cst_96 {dimension_numbers = #tpu.dot_dimension_numbers<[1], [0], [0], [1], [0, 0, 1, 1], [], []>} : vector<24x32xbf16>, vector<32x8xbf16>, vector<24x8xf32> -> vector<24x8xf32>
    %c0_97 = arith.constant 0 : index
    %c2_98 = arith.constant 2 : index
    %c0_99 = arith.constant 0 : index
    %c0_100 = arith.constant 0 : index
    %117 = vector.load %arg14[%c0_97, %c2_98, %c0_99, %c0_100] : memref<1x4x1x8xf32, #tpu.memory_space<vmem>>, vector<1x1x1x8xf32>
    %118 = vector.shape_cast %117 : vector<1x1x1x8xf32> to vector<1x8xf32>
    %119 = vector.broadcast %118 : vector<1x8xf32> to vector<24x8xf32>
    %120 = arith.addf %116, %119 : vector<24x8xf32>
    %cst_101 = arith.constant dense<0.000000e+00> : vector<24x24xf32>
    %121 = tpu.matmul %106, %113, %cst_101 {dimension_numbers = #tpu.dot_dimension_numbers<[1], [1], [0], [0], [0, 0, 1, 0], [], []>} : vector<24x8xf32>, vector<24x8xf32>, vector<24x24xf32> -> vector<24x24xf32>
    %122 = arith.addf %121, %4 : vector<24x24xf32>
    %cst_102 = arith.constant dense<0xFF800000> : vector<24xf32>
    %123 = vector.multi_reduction <maximumf>, %122, %cst_102 [1] : vector<24x24xf32> to vector<24xf32>
    %124 = vector.shape_cast %123 : vector<24xf32> to vector<24x1xf32>
    %125 = vector.broadcast %124 : vector<24x1xf32> to vector<24x24xf32>
    %126 = arith.subf %122, %125 : vector<24x24xf32>
    %127 = math.exp %126 : vector<24x24xf32>
    %cst_103 = arith.constant dense<0.000000e+00> : vector<24xf32>
    %128 = vector.multi_reduction <add>, %127, %cst_103 [1] : vector<24x24xf32> to vector<24xf32>
    %129 = vector.shape_cast %128 : vector<24xf32> to vector<24x1xf32>
    %130 = tpu.reciprocal %129 {approx = true} : vector<24x1xf32> -> vector<24x1xf32>
    %131 = vector.broadcast %130 : vector<24x1xf32> to vector<24x24xf32>
    %132 = arith.mulf %127, %131 : vector<24x24xf32>
    %cst_104 = arith.constant dense<0.000000e+00> : vector<24x8xf32>
    %133 = tpu.matmul %132, %120, %cst_104 {dimension_numbers = #tpu.dot_dimension_numbers<[1], [0], [0], [1], [0, 0, 1, 1], [], []>} : vector<24x24xf32>, vector<24x8xf32>, vector<24x8xf32> -> vector<24x8xf32>
    %c0_105 = arith.constant 0 : index
    %c3 = arith.constant 3 : index
    %c0_106 = arith.constant 0 : index
    %c0_107 = arith.constant 0 : index
    %134 = vector.load %arg9[%c0_105, %c3, %c0_106, %c0_107] : memref<1x4x32x8xbf16, #tpu.memory_space<vmem>>, vector<1x1x32x8xbf16>
    %135 = vector.shape_cast %134 : vector<1x1x32x8xbf16> to vector<32x8xbf16>
    %cst_108 = arith.constant dense<0.000000e+00> : vector<24x8xf32>
    %136 = tpu.matmul %31, %135, %cst_108 {dimension_numbers = #tpu.dot_dimension_numbers<[1], [0], [0], [1], [0, 0, 1, 1], [], []>} : vector<24x32xbf16>, vector<32x8xbf16>, vector<24x8xf32> -> vector<24x8xf32>
    %c0_109 = arith.constant 0 : index
    %c3_110 = arith.constant 3 : index
    %c0_111 = arith.constant 0 : index
    %c0_112 = arith.constant 0 : index
    %137 = vector.load %arg10[%c0_109, %c3_110, %c0_111, %c0_112] : memref<1x4x1x8xf32, #tpu.memory_space<vmem>>, vector<1x1x1x8xf32>
    %138 = vector.shape_cast %137 : vector<1x1x1x8xf32> to vector<1x8xf32>
    %139 = vector.broadcast %138 : vector<1x8xf32> to vector<24x8xf32>
    %140 = arith.addf %136, %139 : vector<24x8xf32>
    %c0_113 = arith.constant 0 : index
    %c3_114 = arith.constant 3 : index
    %c0_115 = arith.constant 0 : index
    %c0_116 = arith.constant 0 : index
    %141 = vector.load %arg11[%c0_113, %c3_114, %c0_115, %c0_116] : memref<1x4x32x8xbf16, #tpu.memory_space<vmem>>, vector<1x1x32x8xbf16>
    %142 = vector.shape_cast %141 : vector<1x1x32x8xbf16> to vector<32x8xbf16>
    %cst_117 = arith.constant dense<0.000000e+00> : vector<24x8xf32>
    %143 = tpu.matmul %31, %142, %cst_117 {dimension_numbers = #tpu.dot_dimension_numbers<[1], [0], [0], [1], [0, 0, 1, 1], [], []>} : vector<24x32xbf16>, vector<32x8xbf16>, vector<24x8xf32> -> vector<24x8xf32>
    %c0_118 = arith.constant 0 : index
    %c3_119 = arith.constant 3 : index
    %c0_120 = arith.constant 0 : index
    %c0_121 = arith.constant 0 : index
    %144 = vector.load %arg12[%c0_118, %c3_119, %c0_120, %c0_121] : memref<1x4x1x8xf32, #tpu.memory_space<vmem>>, vector<1x1x1x8xf32>
    %145 = vector.shape_cast %144 : vector<1x1x1x8xf32> to vector<1x8xf32>
    %146 = vector.broadcast %145 : vector<1x8xf32> to vector<24x8xf32>
    %147 = arith.addf %143, %146 : vector<24x8xf32>
    %c0_122 = arith.constant 0 : index
    %c3_123 = arith.constant 3 : index
    %c0_124 = arith.constant 0 : index
    %c0_125 = arith.constant 0 : index
    %148 = vector.load %arg13[%c0_122, %c3_123, %c0_124, %c0_125] : memref<1x4x32x8xbf16, #tpu.memory_space<vmem>>, vector<1x1x32x8xbf16>
    %149 = vector.shape_cast %148 : vector<1x1x32x8xbf16> to vector<32x8xbf16>
    %cst_126 = arith.constant dense<0.000000e+00> : vector<24x8xf32>
    %150 = tpu.matmul %31, %149, %cst_126 {dimension_numbers = #tpu.dot_dimension_numbers<[1], [0], [0], [1], [0, 0, 1, 1], [], []>} : vector<24x32xbf16>, vector<32x8xbf16>, vector<24x8xf32> -> vector<24x8xf32>
    %c0_127 = arith.constant 0 : index
    %c3_128 = arith.constant 3 : index
    %c0_129 = arith.constant 0 : index
    %c0_130 = arith.constant 0 : index
    %151 = vector.load %arg14[%c0_127, %c3_128, %c0_129, %c0_130] : memref<1x4x1x8xf32, #tpu.memory_space<vmem>>, vector<1x1x1x8xf32>
    %152 = vector.shape_cast %151 : vector<1x1x1x8xf32> to vector<1x8xf32>
    %153 = vector.broadcast %152 : vector<1x8xf32> to vector<24x8xf32>
    %154 = arith.addf %150, %153 : vector<24x8xf32>
    %cst_131 = arith.constant dense<0.000000e+00> : vector<24x24xf32>
    %155 = tpu.matmul %140, %147, %cst_131 {dimension_numbers = #tpu.dot_dimension_numbers<[1], [1], [0], [0], [0, 0, 1, 0], [], []>} : vector<24x8xf32>, vector<24x8xf32>, vector<24x24xf32> -> vector<24x24xf32>
    %156 = arith.addf %155, %4 : vector<24x24xf32>
    %cst_132 = arith.constant dense<0xFF800000> : vector<24xf32>
    %157 = vector.multi_reduction <maximumf>, %156, %cst_132 [1] : vector<24x24xf32> to vector<24xf32>
    %158 = vector.shape_cast %157 : vector<24xf32> to vector<24x1xf32>
    %159 = vector.broadcast %158 : vector<24x1xf32> to vector<24x24xf32>
    %160 = arith.subf %156, %159 : vector<24x24xf32>
    %161 = math.exp %160 : vector<24x24xf32>
    %cst_133 = arith.constant dense<0.000000e+00> : vector<24xf32>
    %162 = vector.multi_reduction <add>, %161, %cst_133 [1] : vector<24x24xf32> to vector<24xf32>
    %163 = vector.shape_cast %162 : vector<24xf32> to vector<24x1xf32>
    %164 = tpu.reciprocal %163 {approx = true} : vector<24x1xf32> -> vector<24x1xf32>
    %165 = vector.broadcast %164 : vector<24x1xf32> to vector<24x24xf32>
    %166 = arith.mulf %161, %165 : vector<24x24xf32>
    %cst_134 = arith.constant dense<0.000000e+00> : vector<24x8xf32>
    %167 = tpu.matmul %166, %154, %cst_134 {dimension_numbers = #tpu.dot_dimension_numbers<[1], [0], [0], [1], [0, 0, 1, 1], [], []>} : vector<24x24xf32>, vector<24x8xf32>, vector<24x8xf32> -> vector<24x8xf32>
    %168 = tpu.concatenate %65, %99, %133, %167 in 1 : vector<24x8xf32>, vector<24x8xf32>, vector<24x8xf32>, vector<24x8xf32> -> vector<24x32xf32>
    %169 = arith.truncf %168 : vector<24x32xf32> to vector<24x32xbf16>
    %c0_135 = arith.constant 0 : index
    %c0_136 = arith.constant 0 : index
    %c0_137 = arith.constant 0 : index
    %170 = vector.load %arg15[%c0_135, %c0_136, %c0_137] : memref<1x32x32xbf16, #tpu.memory_space<vmem>>, vector<1x32x32xbf16>
    %171 = vector.shape_cast %170 : vector<1x32x32xbf16> to vector<32x32xbf16>
    %cst_138 = arith.constant dense<0.000000e+00> : vector<24x32xf32>
    %172 = tpu.matmul %169, %171, %cst_138 {dimension_numbers = #tpu.dot_dimension_numbers<[1], [0], [0], [1], [0, 0, 1, 1], [], []>} : vector<24x32xbf16>, vector<32x32xbf16>, vector<24x32xf32> -> vector<24x32xf32>
    %173 = arith.addf %3, %172 : vector<24x32xf32>
    %c0_139 = arith.constant 0 : index
    %c0_140 = arith.constant 0 : index
    %c0_141 = arith.constant 0 : index
    %174 = vector.load %arg16[%c0_139, %c0_140, %c0_141] : memref<1x1x32xf32, #tpu.memory_space<vmem>>, vector<1x1x32xf32>
    %175 = vector.shape_cast %174 : vector<1x1x32xf32> to vector<1x32xf32>
    %176 = vector.broadcast %175 : vector<1x32xf32> to vector<24x32xf32>
    %177 = arith.addf %173, %176 : vector<24x32xf32>
    %c0_142 = arith.constant 0 : index
    %c0_143 = arith.constant 0 : index
    %c0_144 = arith.constant 0 : index
    %178 = vector.load %arg17[%c0_142, %c0_143, %c0_144] : memref<1x1x32xf32, #tpu.memory_space<vmem>>, vector<1x1x32xf32>
    %179 = vector.shape_cast %178 : vector<1x1x32xf32> to vector<1x32xf32>
    %c0_145 = arith.constant 0 : index
    %c0_146 = arith.constant 0 : index
    %c0_147 = arith.constant 0 : index
    %180 = vector.load %arg18[%c0_145, %c0_146, %c0_147] : memref<1x1x32xf32, #tpu.memory_space<vmem>>, vector<1x1x32xf32>
    %181 = vector.shape_cast %180 : vector<1x1x32xf32> to vector<1x32xf32>
    %cst_148 = arith.constant dense<0.000000e+00> : vector<24xf32>
    %182 = vector.multi_reduction <add>, %177, %cst_148 [1] : vector<24x32xf32> to vector<24xf32>
    %183 = vector.shape_cast %182 : vector<24xf32> to vector<24x1xf32>
    %cst_149 = arith.constant 3.200000e+01 : f32
    %184 = vector.broadcast %cst_149 : f32 to vector<24x1xf32>
    %185 = arith.divf %183, %184 : vector<24x1xf32>
    %186 = vector.broadcast %185 : vector<24x1xf32> to vector<24x32xf32>
    %187 = arith.subf %177, %186 : vector<24x32xf32>
    %188 = arith.mulf %187, %187 : vector<24x32xf32>
    %cst_150 = arith.constant dense<0.000000e+00> : vector<24xf32>
    %189 = vector.multi_reduction <add>, %188, %cst_150 [1] : vector<24x32xf32> to vector<24xf32>
    %190 = vector.shape_cast %189 : vector<24xf32> to vector<24x1xf32>
    %cst_151 = arith.constant 3.200000e+01 : f32
    %191 = vector.broadcast %cst_151 : f32 to vector<24x1xf32>
    %192 = arith.divf %190, %191 : vector<24x1xf32>
    %193 = vector.broadcast %185 : vector<24x1xf32> to vector<24x32xf32>
    %194 = arith.subf %177, %193 : vector<24x32xf32>
    %cst_152 = arith.constant 9.99999997E-7 : f32
    %195 = vector.broadcast %cst_152 : f32 to vector<24x1xf32>
    %196 = arith.addf %192, %195 : vector<24x1xf32>
    %197 = math.rsqrt %196 : vector<24x1xf32>
    %198 = vector.broadcast %197 : vector<24x1xf32> to vector<24x32xf32>
    %199 = arith.mulf %194, %198 : vector<24x32xf32>
    %200 = vector.broadcast %179 : vector<1x32xf32> to vector<24x32xf32>
    %201 = arith.mulf %199, %200 : vector<24x32xf32>
    %202 = vector.broadcast %181 : vector<1x32xf32> to vector<24x32xf32>
    %203 = arith.addf %201, %202 : vector<24x32xf32>
    %204 = arith.truncf %203 : vector<24x32xf32> to vector<24x32xbf16>
    %c0_153 = arith.constant 0 : index
    %c0_154 = arith.constant 0 : index
    %c0_155 = arith.constant 0 : index
    %205 = vector.load %arg19[%c0_153, %c0_154, %c0_155] : memref<1x32x128xbf16, #tpu.memory_space<vmem>>, vector<1x32x128xbf16>
    %206 = vector.shape_cast %205 : vector<1x32x128xbf16> to vector<32x128xbf16>
    %cst_156 = arith.constant dense<0.000000e+00> : vector<24x128xf32>
    %207 = tpu.matmul %204, %206, %cst_156 {dimension_numbers = #tpu.dot_dimension_numbers<[1], [0], [0], [1], [0, 0, 1, 1], [], []>} : vector<24x32xbf16>, vector<32x128xbf16>, vector<24x128xf32> -> vector<24x128xf32>
    %c0_157 = arith.constant 0 : index
    %c0_158 = arith.constant 0 : index
    %c0_159 = arith.constant 0 : index
    %208 = vector.load %arg20[%c0_157, %c0_158, %c0_159] : memref<1x1x128xf32, #tpu.memory_space<vmem>>, vector<1x1x128xf32>
    %209 = vector.shape_cast %208 : vector<1x1x128xf32> to vector<1x128xf32>
    %210 = vector.broadcast %209 : vector<1x128xf32> to vector<24x128xf32>
    %211 = arith.addf %207, %210 : vector<24x128xf32>
    %cst_160 = arith.constant 5.000000e-01 : f32
    %212 = vector.broadcast %cst_160 : f32 to vector<24x128xf32>
    %213 = arith.mulf %212, %211 : vector<24x128xf32>
    %cst_161 = arith.constant 4.471500e-02 : f32
    %214 = vector.broadcast %cst_161 : f32 to vector<24x128xf32>
    %215 = arith.mulf %214, %211 : vector<24x128xf32>
    %216 = arith.mulf %215, %211 : vector<24x128xf32>
    %217 = arith.mulf %216, %211 : vector<24x128xf32>
    %218 = arith.addf %211, %217 : vector<24x128xf32>
    %cst_162 = arith.constant 0.797884583 : f32
    %219 = vector.broadcast %cst_162 : f32 to vector<24x128xf32>
    %220 = arith.mulf %219, %218 : vector<24x128xf32>
    %221 = math.tanh %220 : vector<24x128xf32>
    %cst_163 = arith.constant 1.000000e+00 : f32
    %222 = vector.broadcast %cst_163 : f32 to vector<24x128xf32>
    %223 = arith.addf %222, %221 : vector<24x128xf32>
    %224 = arith.mulf %213, %223 : vector<24x128xf32>
    %225 = arith.truncf %224 : vector<24x128xf32> to vector<24x128xbf16>
    %c0_164 = arith.constant 0 : index
    %c0_165 = arith.constant 0 : index
    %c0_166 = arith.constant 0 : index
    %226 = vector.load %arg21[%c0_164, %c0_165, %c0_166] : memref<1x128x32xbf16, #tpu.memory_space<vmem>>, vector<1x128x32xbf16>
    %227 = vector.shape_cast %226 : vector<1x128x32xbf16> to vector<128x32xbf16>
    %cst_167 = arith.constant dense<0.000000e+00> : vector<24x32xf32>
    %228 = tpu.matmul %225, %227, %cst_167 {dimension_numbers = #tpu.dot_dimension_numbers<[1], [0], [0], [1], [0, 0, 1, 1], [], []>} : vector<24x128xbf16>, vector<128x32xbf16>, vector<24x32xf32> -> vector<24x32xf32>
    %229 = arith.addf %177, %228 : vector<24x32xf32>
    %c0_168 = arith.constant 0 : index
    %c0_169 = arith.constant 0 : index
    %c0_170 = arith.constant 0 : index
    %230 = vector.load %arg22[%c0_168, %c0_169, %c0_170] : memref<1x1x32xf32, #tpu.memory_space<vmem>>, vector<1x1x32xf32>
    %231 = vector.shape_cast %230 : vector<1x1x32xf32> to vector<1x32xf32>
    %232 = vector.broadcast %231 : vector<1x32xf32> to vector<24x32xf32>
    %233 = arith.addf %229, %232 : vector<24x32xf32>
    %c0_171 = arith.constant 0 : index
    %c0_172 = arith.constant 0 : index
    %234 = vector.load %arg26[%c0_171, %c0_172] : memref<24x32xf32, #tpu.memory_space<vmem>>, vector<24x32xf32>
    tpu.vector_store %arg26[%c0_171, %c0_172], %233 {strides = array<i32>} : memref<24x32xf32, #tpu.memory_space<vmem>>, vector<24x32xf32>,
    %c1_i32 = arith.constant 1 : i32
    %235 = arith.cmpi eq, %arg0, %c1_i32 : i32
    %236 = arith.extui %235 : i1 to i32
    %c0_i32_173 = arith.constant 0 : i32
    %237 = arith.cmpi ne, %236, %c0_i32_173 : i32
    scf.if %237 {
      %c0_174 = arith.constant 0 : index
      %c0_175 = arith.constant 0 : index
      %238 = vector.load %arg23[%c0_174, %c0_175] : memref<1x32xf32, #tpu.memory_space<vmem>>, vector<1x32xf32>
      %c0_176 = arith.constant 0 : index
      %c0_177 = arith.constant 0 : index
      %239 = vector.load %arg24[%c0_176, %c0_177] : memref<1x32xf32, #tpu.memory_space<vmem>>, vector<1x32xf32>
      %cst_178 = arith.constant dense<0.000000e+00> : vector<24xf32>
      %240 = vector.multi_reduction <add>, %233, %cst_178 [1] : vector<24x32xf32> to vector<24xf32>
      %241 = vector.shape_cast %240 : vector<24xf32> to vector<24x1xf32>
      %cst_179 = arith.constant 3.200000e+01 : f32
      %242 = vector.broadcast %cst_179 : f32 to vector<24x1xf32>
      %243 = arith.divf %241, %242 : vector<24x1xf32>
      %244 = vector.broadcast %243 : vector<24x1xf32> to vector<24x32xf32>
      %245 = arith.subf %233, %244 : vector<24x32xf32>
      %246 = arith.mulf %245, %245 : vector<24x32xf32>
      %cst_180 = arith.constant dense<0.000000e+00> : vector<24xf32>
      %247 = vector.multi_reduction <add>, %246, %cst_180 [1] : vector<24x32xf32> to vector<24xf32>
      %248 = vector.shape_cast %247 : vector<24xf32> to vector<24x1xf32>
      %cst_181 = arith.constant 3.200000e+01 : f32
      %249 = vector.broadcast %cst_181 : f32 to vector<24x1xf32>
      %250 = arith.divf %248, %249 : vector<24x1xf32>
      %251 = vector.broadcast %243 : vector<24x1xf32> to vector<24x32xf32>
      %252 = arith.subf %233, %251 : vector<24x32xf32>
      %cst_182 = arith.constant 9.99999997E-7 : f32
      %253 = vector.broadcast %cst_182 : f32 to vector<24x1xf32>
      %254 = arith.addf %250, %253 : vector<24x1xf32>
      %255 = math.rsqrt %254 : vector<24x1xf32>
      %256 = vector.broadcast %255 : vector<24x1xf32> to vector<24x32xf32>
      %257 = arith.mulf %252, %256 : vector<24x32xf32>
      %258 = vector.broadcast %238 : vector<1x32xf32> to vector<24x32xf32>
      %259 = arith.mulf %257, %258 : vector<24x32xf32>
      %260 = vector.broadcast %239 : vector<1x32xf32> to vector<24x32xf32>
      %261 = arith.addf %259, %260 : vector<24x32xf32>
      %c0_183 = arith.constant 0 : index
      %c0_184 = arith.constant 0 : index
      %262 = vector.load %arg25[%c0_183, %c0_184] : memref<24x32xf32, #tpu.memory_space<vmem>>, vector<24x32xf32>
      tpu.vector_store %arg25[%c0_183, %c0_184], %261 {strides = array<i32>} : memref<24x32xf32, #tpu.memory_space<vmem>>, vector<24x32xf32>,
    } else {
    }
    return
  }
  func.func @transform_0(%arg0: i32) -> (i32, i32) {
    %c0_i32 = arith.constant 0 : i32
    %c0_i32_0 = arith.constant 0 : i32
    %c0_i32_1 = arith.constant 0 : i32
    return %c0_i32, %c0_i32_0 : i32, i32
  }
  func.func @transform_1(%arg0: i32) -> (i32, i32) {
    %c0_i32 = arith.constant 0 : i32
    %c0_i32_0 = arith.constant 0 : i32
    %c0_i32_1 = arith.constant 0 : i32
    return %c0_i32, %c0_i32_0 : i32, i32
  }
  func.func @transform_2(%arg0: i32) -> (i32, i32) {
    %c0_i32 = arith.constant 0 : i32
    %c0_i32_0 = arith.constant 0 : i32
    %c0_i32_1 = arith.constant 0 : i32
    return %c0_i32, %c0_i32_0 : i32, i32
  }
  func.func @transform_3(%arg0: i32) -> (i32, i32) {
    %c0_i32 = arith.constant 0 : i32
    %c0_i32_0 = arith.constant 0 : i32
    %c0_i32_1 = arith.constant 0 : i32
    return %c0_i32, %c0_i32_0 : i32, i32
  }
  func.func @transform_4(%arg0: i32) -> (i32, i32) {
    %c0_i32 = arith.constant 0 : i32
    %c0_i32_0 = arith.constant 0 : i32
    %c0_i32_1 = arith.constant 0 : i32
    return %c0_i32, %c0_i32_0 : i32, i32
  }
  func.func @transform_5(%arg0: i32) -> (i32, i32) {
    %c0_i32 = arith.constant 0 : i32
    %c0_i32_0 = arith.constant 0 : i32
    %c0_i32_1 = arith.constant 0 : i32
    return %c0_i32, %c0_i32_0 : i32, i32
  }
  func.func @transform_6(%arg0: i32) -> (i32, i32, i32) {
    %c0_i32 = arith.constant 0 : i32
    %c0_i32_0 = arith.constant 0 : i32
    %c0_i32_1 = arith.constant 0 : i32
    return %arg0, %c0_i32, %c0_i32_0 : i32, i32, i32
  }
  func.func @transform_7(%arg0: i32) -> (i32, i32, i32) {
    %c0_i32 = arith.constant 0 : i32
    %c0_i32_0 = arith.constant 0 : i32
    %c0_i32_1 = arith.constant 0 : i32
    return %arg0, %c0_i32, %c0_i32_0 : i32, i32, i32
  }
  func.func @transform_8(%arg0: i32) -> (i32, i32, i32, i32) {
    %c0_i32 = arith.constant 0 : i32
    %c0_i32_0 = arith.constant 0 : i32
    %c0_i32_1 = arith.constant 0 : i32
    %c0_i32_2 = arith.constant 0 : i32
    return %arg0, %c0_i32, %c0_i32_0, %c0_i32_1 : i32, i32, i32, i32
  }
  func.func @transform_9(%arg0: i32) -> (i32, i32, i32, i32) {
    %c0_i32 = arith.constant 0 : i32
    %c0_i32_0 = arith.constant 0 : i32
    %c0_i32_1 = arith.constant 0 : i32
    %c0_i32_2 = arith.constant 0 : i32
    return %arg0, %c0_i32, %c0_i32_0, %c0_i32_1 : i32, i32, i32, i32
  }
  func.func @transform_10(%arg0: i32) -> (i32, i32, i32, i32) {
    %c0_i32 = arith.constant 0 : i32
    %c0_i32_0 = arith.constant 0 : i32
    %c0_i32_1 = arith.constant 0 : i32
    %c0_i32_2 = arith.constant 0 : i32
    return %arg0, %c0_i32, %c0_i32_0, %c0_i32_1 : i32, i32, i32, i32
  }
  func.func @transform_11(%arg0: i32) -> (i32, i32, i32, i32) {
    %c0_i32 = arith.constant 0 : i32
    %c0_i32_0 = arith.constant 0 : i32
    %c0_i32_1 = arith.constant 0 : i32
    %c0_i32_2 = arith.constant 0 : i32
    return %arg0, %c0_i32, %c0_i32_0, %c0_i32_1 : i32, i32, i32, i32
  }
  func.func @transform_12(%arg0: i32) -> (i32, i32, i32, i32) {
    %c0_i32 = arith.constant 0 : i32
    %c0_i32_0 = arith.constant 0 : i32
    %c0_i32_1 = arith.constant 0 : i32
    %c0_i32_2 = arith.constant 0 : i32
    return %arg0, %c0_i32, %c0_i32_0, %c0_i32_1 : i32, i32, i32, i32
  }
  func.func @transform_13(%arg0: i32) -> (i32, i32, i32, i32) {
    %c0_i32 = arith.constant 0 : i32
    %c0_i32_0 = arith.constant 0 : i32
    %c0_i32_1 = arith.constant 0 : i32
    %c0_i32_2 = arith.constant 0 : i32
    return %arg0, %c0_i32, %c0_i32_0, %c0_i32_1 : i32, i32, i32, i32
  }
  func.func @transform_14(%arg0: i32) -> (i32, i32, i32) {
    %c0_i32 = arith.constant 0 : i32
    %c0_i32_0 = arith.constant 0 : i32
    %c0_i32_1 = arith.constant 0 : i32
    return %arg0, %c0_i32, %c0_i32_0 : i32, i32, i32
  }
  func.func @transform_15(%arg0: i32) -> (i32, i32, i32) {
    %c0_i32 = arith.constant 0 : i32
    %c0_i32_0 = arith.constant 0 : i32
    %c0_i32_1 = arith.constant 0 : i32
    return %arg0, %c0_i32, %c0_i32_0 : i32, i32, i32
  }
  func.func @transform_16(%arg0: i32) -> (i32, i32, i32) {
    %c0_i32 = arith.constant 0 : i32
    %c0_i32_0 = arith.constant 0 : i32
    %c0_i32_1 = arith.constant 0 : i32
    return %arg0, %c0_i32, %c0_i32_0 : i32, i32, i32
  }
  func.func @transform_17(%arg0: i32) -> (i32, i32, i32) {
    %c0_i32 = arith.constant 0 : i32
    %c0_i32_0 = arith.constant 0 : i32
    %c0_i32_1 = arith.constant 0 : i32
    return %arg0, %c0_i32, %c0_i32_0 : i32, i32, i32
  }
  func.func @transform_18(%arg0: i32) -> (i32, i32, i32) {
    %c0_i32 = arith.constant 0 : i32
    %c0_i32_0 = arith.constant 0 : i32
    %c0_i32_1 = arith.constant 0 : i32
    return %arg0, %c0_i32, %c0_i32_0 : i32, i32, i32
  }
  func.func @transform_19(%arg0: i32) -> (i32, i32, i32) {
    %c0_i32 = arith.constant 0 : i32
    %c0_i32_0 = arith.constant 0 : i32
    %c0_i32_1 = arith.constant 0 : i32
    return %arg0, %c0_i32, %c0_i32_0 : i32, i32, i32
  }
  func.func @transform_20(%arg0: i32) -> (i32, i32, i32) {
    %c0_i32 = arith.constant 0 : i32
    %c0_i32_0 = arith.constant 0 : i32
    %c0_i32_1 = arith.constant 0 : i32
    return %arg0, %c0_i32, %c0_i32_0 : i32, i32, i32
  }
  func.func @transform_21(%arg0: i32) -> (i32, i32, i32) {
    %c0_i32 = arith.constant 0 : i32
    %c0_i32_0 = arith.constant 0 : i32
    %c0_i32_1 = arith.constant 0 : i32
    return %arg0, %c0_i32, %c0_i32_0 : i32, i32, i32
  }
  func.func @transform_22(%arg0: i32) -> (i32, i32) {
    %c0_i32 = arith.constant 0 : i32
    %c0_i32_0 = arith.constant 0 : i32
    %c0_i32_1 = arith.constant 0 : i32
    return %c0_i32, %c0_i32_0 : i32, i32
  }
  func.func @transform_23(%arg0: i32) -> (i32, i32) {
    %c0_i32 = arith.constant 0 : i32
    %c0_i32_0 = arith.constant 0 : i32
    %c0_i32_1 = arith.constant 0 : i32
    return %c0_i32, %c0_i32_0 : i32, i32
  }
  func.func @transform_24(%arg0: i32) -> (i32, i32) {
    %c0_i32 = arith.constant 0 : i32
    %c0_i32_0 = arith.constant 0 : i32
    %c0_i32_1 = arith.constant 0 : i32
    return %c0_i32, %c0_i32_0 : i32, i32
  }
}

</mosaic_0001>

<bundles_post_ra>
// kernel: foveated_vit_forward.1
= control target key start
LH: loop header
LB: loop body
LE: loop exit
PB: predicated region body
PF: predicated region fallthrough
CT: control target
= control target key end

     0   :  { %s5089_s0 = inlined_call_operand.vmem [shape: f32[16,192], index: 0, kind: input, shape index: {}]   ;;  %s5090_s1 = inlined_call_operand.vmem [shape: f32[8,32], index: 1, kind: input, shape index: {}]   ;;  %s5091_s2 = inlined_call_operand.vmem [shape: f32[4,32], index: 2, kind: input, shape index: {}]   ;;  %s5092_s3 = inlined_call_operand.vmem [shape: bf16[192,32], index: 3, kind: input, shape index: {}]   ;;  %s5093_s4 = inlined_call_operand.vmem [shape: f32[1,32], index: 4, kind: input, shape index: {}]   ;;  %s5094_s5 = inlined_call_operand.vmem [shape: f32[24,24], index: 5, kind: input, shape index: {}]   ;;  %s5095_s6 = inlined_call_operand.vmem [shape: f32[2,1,32], index: 6, kind: input, shape index: {}]   ;;  %s5096_s7 = inlined_call_operand.vmem [shape: f32[2,1,32], index: 7, kind: input, shape index: {}]   ;;  %s5097_s8 = inlined_call_operand.vmem [shape: bf16[2,4,32,8], index: 8, kind: input, shape index: {}]   ;;  %s5098_s9 = inlined_call_operand.vmem [shape: f32[2,4,1,8], index: 9, kind: input, shape index: {}]   ;;  %s5099_s10 = inlined_call_operand.vmem [shape: bf16[2,4,32,8], index: 10, kind: input, shape index: {}]   ;;  %s5100_s11 = inlined_call_operand.vmem [shape: f32[2,4,1,8], index: 11, kind: input, shape index: {}]   ;;  %s5101_s12 = inlined_call_operand.vmem [shape: bf16[2,4,32,8], index: 12, kind: input, shape index: {}]   ;;  %s5102_s13 = inlined_call_operand.vmem [shape: f32[2,4,1,8], index: 13, kind: input, shape index: {}]   ;;  %s5103_s14 = inlined_call_operand.vmem [shape: bf16[2,32,32], index: 14, kind: input, shape index: {}]   ;;  %s5104_s15 = inlined_call_operand.vmem [shape: f32[2,1,32], index: 15, kind: input, shape index: {}]   ;;  %s5105_s16 = inlined_call_operand.vmem [shape: f32[2,1,32], index: 16, kind: input, shape index: {}]   ;;  %s5106_s17 = inlined_call_operand.vmem [shape: f32[2,1,32], index: 17, kind: input, shape index: {}]   ;;  %s5107_s18 = inlined_call_operand.vmem [shape: bf16[2,32,128], index: 18, kind: input, shape index: {}]   ;;  %s5108_s19 = inlined_call_operand.vmem [shape: f32[2,1,128], index: 19, kind: input, shape index: {}]   ;;  %s5109_s20 = inlined_call_operand.vmem [shape: bf16[2,128,32], index: 20, kind: input, shape index: {}]   ;;  %s5110_s21 = inlined_call_operand.vmem [shape: f32[2,1,32], index: 21, kind: input, shape index: {}]   ;;  %s5111_s22 = inlined_call_operand.vmem [shape: f32[1,32], index: 22, kind: input, shape index: {}]   ;;  %s5112_s23 = inlined_call_operand.vmem [shape: f32[1,32], index: 23, kind: input, shape index: {}]   ;;  %s5113_s24 = inlined_call_operand.vmem [shape: f32[24,32], index: 24, kind: output, shape index: {}]  }
   0x1   :  { %5121 = sst [smem:[#allocation6_spill]] %s5089_s0 }
   0x2   :  { %5122 = sst [smem:[#allocation7_spill]] %s5090_s1 }
   0x3   :  { %5123 = sst [smem:[#allocation8_spill]] %s5091_s2 }
   0x4   :  { %5124 = sst [smem:[#allocation9_spill]] %s5092_s3 }
   0x5   :  { %5125 = sst [smem:[#allocation10_spill]] %s5093_s4 }
   0x6   :  { %5126 = sst [smem:[#allocation11_spill]] %s5094_s5  ;;  %s4513_s5 = smov 0  }
   0x7   :  { %5127 = sst [smem:[#allocation12_spill]] %s5095_s6 }
   0x8   :  { %5128 = sst [smem:[#allocation13_spill]] %s5096_s7 }
   0x9   :  { %5129 = sst [smem:[#allocation14_spill]] %s5097_s8 }
   0xa   :  { %5130 = sst [smem:[#allocation15_spill]] %s5098_s9 }
   0xb   :  { %5131 = sst [smem:[#allocation16_spill]] %s5099_s10 }
   0xc   :  { %5132 = sst [smem:[#allocation17_spill]] %s5100_s11 }
   0xd   :  { %5133 = sst [smem:[#allocation18_spill]] %s5101_s12 }
   0xe   :  { %5134 = sst [smem:[#allocation19_spill]] %s5102_s13 }
   0xf   :  { %5135 = sst [smem:[#allocation20_spill]] %s5103_s14 }
  0x10   :  { %5136 = sst [smem:[#allocation21_spill]] %s5111_s22 }
  0x11   :  { %5137 = sst [smem:[#allocation22_spill]] %s5112_s23 }
  0x12   :  { %5138 = sst [smem:[#allocation23_spill]] %s5113_s24 }
  0x13 LB: > { %5139 = sst [smem:[#allocation3_spill]] %s4380_s5  ;;  %s4519_s26 = sadd.s32 4294967295, %s4380_s5   ;;  %s4380_s5 = sphi %s4513_s5, %s34_s5  }
  0x14   : > { %5140 = sst [smem:[#allocation4_spill]] %s4519_s26  ;;  %p3650_p0 = scmp.ge.s32.totalorder %s4380_s5, 1 }
  0x15   : > { %p790_p1 = scmp.lt.s32.totalorder %s4380_s5, 3 }
  0x17   : > { %p791_p2 = pnand %p3650_p0, %p790_p1 }
  0x19   : > { %794 = sbr.rel (%p791_p2) target bundleno = 5105 (0x13f1), region = 116 }
  0x1e   : > { %p909_p3 = scmp.lt.s32.totalorder %s4519_s26, 1  ;;  %s5143_s5 = sld [smem:[#allocation14_spill]] }
  0x1f   : > { %s5144_s9 = sld [smem:[#allocation15_spill]] }
  0x20   : > { %s4525_s27 = scalar_select %p909_p3, %s4519_s26, 1 }
  0x21   : > { %s5146_s10 = sld [smem:[#allocation16_spill]] }
  0x22   : > { %s3850_s25 = sshll.u32 %s4525_s27, 6  ;;  %s3653_s8 = sshll.u32 %s4525_s27, 2 }
  0x23   : > { %s5147_s11 = sld [smem:[#allocation17_spill]]  ;;  %s3853_s6 = sshll.u32 %s4525_s27, 4 }
  0x24   : > { %s4540_s28 = scalar_lea.vmem %s5143_s5, %s3850_s25  ;;  %s5148_s12 = sld [smem:[#allocation18_spill]] }
  0x25   : > { %s4545_s23 = scalar_lea.vmem %s5144_s9, %s3653_s8  ;;  %s5149_s13 = sld [smem:[#allocation19_spill]] }
  0x26   : > { %5145 = sst [smem:[#allocation5_spill]] %s4545_s23  ;;  %s955_s4 = scalar_lea.vmem %s5106_s17, %s4525_s27 }
  0x27   : > { %s4550_s29 = scalar_lea.vmem %s5146_s10, %s3850_s25  ;;  %s5150_s14 = sld [smem:[#allocation20_spill]] }
  0x28   : > { %s963_s2 = scalar_lea.vmem %s5108_s19, %s4525_s27  ;;  %s971_s26 = scalar_lea.vmem %s5110_s21, %s4525_s27 }
  0x29   : > { %s4555_s30 = scalar_lea.vmem %s5147_s11, %s3653_s8 }
  0x2a   : > { %s4560_s5 = scalar_lea.vmem %s5148_s12, %s3850_s25  ;;  %s5151_s12 = sld [smem:[#allocation4_spill]] }
  0x2b   : > { %s4565_s24 = scalar_lea.vmem %s5149_s13, %s3653_s8  ;;  %s4588_s13 = scalar_lea.vmem %s5107_s18, %s3853_s6 }
  0x2d   : > { %s4575_s0 = scalar_lea.vmem %s5150_s14, %s3853_s6  ;;  %s4597_s14 = scalar_lea.vmem %s5109_s20, %s3850_s25 }
  0x30   : > { %p3666_p4 = scmp.ne.s32.totalorder %s5151_s12, 0 }
  0x31   : > { %s5152_s6 = sld [smem:[#allocation9_spill]] (!%p3666_p4) }
  0x32   : > { %976 = sbr.rel (%p3666_p4) target bundleno = 306 (0x132), region = 120  ;;  %s5153_s12 = sld [smem:[#allocation6_spill]] (!%p3666_p4) }
  0x33   : > { %s5154_s25 = sld [smem:[#allocation8_spill]] (!%p3666_p4) }
  0x34   : > { %s5155_s23 = sld [smem:[#allocation10_spill]] (!%p3666_p4) }
  0x35   : > { %s5156_s3 = sld [smem:[#allocation7_spill]] (!%p3666_p4) }
  0x37   : > { %v4236_v0 = vld [vmem:[%s5152_s6 + $0x38] sm:$0xff]   ;;  %v4382_v1 = vmov 0   ;;  %v4237_v2 = vld [vmem:[%s5152_s6 + $0x30] sm:$0xff]   ;;  %v4238_v3 = vld [vmem:[%s5152_s6 + $0x28] sm:$0xff]   ;;  %vm1087_vm0 = vcmask 523264   ;;  %vm1133_vm1 = vcmask 257024  }
  0x38   : > { %1091 = vmatprep.subr.bf16.mxu0 %v4382_v1  ;;  %v4239_v4 = vld [vmem:[%s5152_s6 + $0x20] sm:$0xff]   ;;  %v979_v5 = vld [vmem:[%s5153_s12 + $0x8] sm:$0xff]  ;;  %v981_v6 = vld [vmem:[%s5153_s12 + $0x18] sm:$0xff]  ;;  %vm1137_vm2 = vcmask 261120  }
  0x39   : > { %1092 = vmatpush1.bf16.msra.mxu0 %v4236_v0  ;;  %v983_v7 = vpack.c.bf16 %v981_v6, %v979_v5  ;;  %v4240_v8 = vld [vmem:[%s5152_s6 + $0x18] sm:$0xff]   ;;  %v4241_v9 = vld [vmem:[%s5152_s6 + $0x10] sm:$0xff]   ;;  %v4242_v10 = vld [vmem:[%s5152_s6 + $0x8] sm:$0xff]  }
  0x3a   : > { %1093 = vmatprep.subr.bf16.mxu0 %v4382_v1  ;;  %v4243_v11 = vld [vmem:[%s5152_s6] sm:$0xff]   ;;  %v4244_v12 = vld [vmem:[%s5152_s6 + $0x58] sm:$0xff]   ;;  %v4245_v13 = vld [vmem:[%s5152_s6 + $0x50] sm:$0xff]  }
  0x3b   : > { %3680 = vmatprep.mubr.msk.bf16.mxu0 %vm1087_vm0, %v983_v7  ;;  %v4246_v14 = vld [vmem:[%s5152_s6 + $0x48] sm:$0xff]   ;;  %v4247_v15 = vld [vmem:[%s5152_s6 + $0x40] sm:$0xff]   ;;  %v980_v17 = vld [vmem:[%s5153_s12 + $0x10] sm:$0xff] }
  0x3c   : > { %v978_v16 = vld [vmem:[%s5153_s12] sm:$0xff] }
  0x3d   : > { %1094 = vmatpush1.bf16.msra.mxu0 %v4237_v2  ;;  %v982_v18 = vpack.c.bf16 %v980_v17, %v978_v16  ;;  %v977_v19 = vld [vmem:[%s5154_s25] sm:$0xf] }
  0x3e   : > { %1095 = vmatprep.subr.bf16.mxu0 %v4382_v1  ;;  %1134 = vst.msk [vmem:[#allocation2] sm:$0xf] %vm1133_vm1, %v977_v19  ;;  %1135 = vst.msk [vmem:[#allocation2 + $0x4] sm:$0xf] %vm1133_vm1, %v977_v19  ;;  %v3667_v20 = vld [vmem:[%s5155_s23] ss:$0 sm:$0xff] }
  0x3f   : > { %v1132_v22 = vld [vmem:[%s5156_s3] sm:$0xff] }
  0x41   : > { %1096 = vmatpush1.bf16.msra.mxu0 %v4238_v3 }
  0x42   : > { %1097 = vmatprep.subr.bf16.mxu0 %v4382_v1 }
  0x45   : > { %1098 = vmatpush1.bf16.msra.mxu0 %v4239_v4 }
  0x46   : > { %1099 = vmatprep.subr.bf16.mxu0 %v4382_v1 }
  0x49   : > { %1100 = vmatpush1.bf16.msra.mxu0 %v4240_v8 }
  0x4a   : > { %1101 = vmatprep.subr.bf16.mxu0 %v4382_v1 }
  0x4d   : > { %1102 = vmatpush1.bf16.msra.mxu0 %v4241_v9 }
  0x4e   : > { %1103 = vmatprep.subr.bf16.mxu0 %v4382_v1 }
  0x51   : > { %1104 = vmatpush1.bf16.msra.mxu0 %v4242_v10 }
  0x52   : > { %1105 = vmatprep.subr.bf16.mxu0 %v4382_v1 }
  0x55   : > { %1106 = vmatpush1.bf16.msra.mxu0 %v4243_v11 }
  0x56   : > { %1115 = vmatprep.subr.bf16.mxu0 %v4382_v1 }
  0x59   : > { %1116 = vmatpush2.bf16.msra.mxu0 %v4244_v12 }
  0x5a   : > { %1117 = vmatprep.subr.bf16.mxu0 %v4382_v1 }
  0x5d   : > { %1118 = vmatpush2.bf16.msra.mxu0 %v4245_v13 }
  0x5e   : > { %1119 = vmatprep.subr.bf16.mxu0 %v4382_v1 }
  0x61   : > { %1120 = vmatpush2.bf16.msra.mxu0 %v4246_v14 }
  0x62   : > { %1121 = vmatprep.subr.bf16.mxu0 %v4382_v1 }
  0x65   : > { %1122 = vmatpush2.bf16.msra.mxu0 %v4247_v15 }
  0x68   : > { %1124 = vmatmul.mubr.bf16.vlgmr.msra.gmra.mxu0 %v982_v18 }
 0x128   : > { %v1125_v21 = vpop.f32.mrf.mxu0 }
 0x129   : > { %v1126_v23 = vadd.f32 %v3667_v20, %v1125_v21 }
 0x12a   : > { %v1127_v24 = vpop.f32.mrf.mxu0 }
 0x12b   : > { %v1136_v25 = vadd.f32 %v1132_v22, %v1126_v23 }
 0x12c   : > { %v1128_v26 = vpop.f32.mrf.mxu0 }
 0x12d   : > { %1138 = vst.msk [vmem:[#allocation2 + $0x8] sm:$0xff] %vm1137_vm2, %v1136_v25  ;;  %v1129_v27 = vadd.f32 %v3667_v20, %v1128_v26 }
 0x12e   : > { %v1130_v28 = vpop.f32.mrf.mxu0 }
 0x12f   : > { %v1139_v29 = vadd.f32 %v1132_v22, %v1129_v27 }
 0x131   : > { %1140 = vst.msk [vmem:[#allocation2 + $0x10] sm:$0xff] %vm1137_vm2, %v1139_v29 }
 0x132 PF: > { %v1141_v30 = vld [vmem:[#allocation2] sm:$0xff]  ;;  %vm1149_vm3 = vcmask 261120   ;;  %v4263_v51 = vld [vmem:[%s4540_s28 + $0x8] sm:$0xff]   ;;  %s5157_s9 = sld [smem:[#allocation12_spill]]  ;;  %v4383_v18 = vmov 0.0   ;;  %vm4384_vm4 = vmmov 0  }
 0x133   : > { %v1150_v33 = vsel %vm1149_vm3, %v1141_v30, 0.0  ;;  %v4264_v52 = vld [vmem:[%s4550_s29 + $0x8] sm:$0xff]   ;;  %3970 = vmatprep.subr.bf16.mxu0 %v4263_v51  ;;  %v4265_v53 = vld [vmem:[%s4540_s28] sm:$0xff]   ;;  %s5159_s23 = sld [smem:[#allocation13_spill]]  ;;  %vm1429_vm5 = vcmask 64512   ;;  %vm1528_vm6 = vcmask 195584  }
 0x134   : > { %v1142_v32 = vld [vmem:[#allocation2 + $0x8] sm:$0xff]  ;;  %1151 = vadd.xlane.f32.xlu0 %v1150_v33  ;;  %3978 = vmatprep.subr.bf16.mxu1 %v4264_v52  ;;  %v4266_v54 = vld [vmem:[%s4550_s29] sm:$0xff]   ;;  %s5161_s7 = sld [smem:[#allocation5_spill]]  ;;  %vm3007_vm7 = vcmask 130048  }
 0x135   : > { %v1153_v35 = vsel %vm1149_vm3, %v1142_v32, 0.0  ;;  %3971 = vmatpush3.bf16.msra.mxu0 %v4263_v51  ;;  %3979 = vmatpush3.bf16.msra.mxu1 %v4264_v52  ;;  %v4267_v55 = vld [vmem:[%s4560_s5 + $0x8] sm:$0xff]   ;;  %v4268_v17 = vld [vmem:[%s4560_s5] sm:$0xff]   ;;  %s5162_s1 = sld [smem:[#allocation11_spill]] }
 0x136   : > { %3972 = vmatprep.subr.bf16.mxu0 %v4265_v53  ;;  %3980 = vmatprep.subr.bf16.mxu1 %v4266_v54  ;;  %v3688_v19 = vld [vmem:[%s4555_s30] ss:$0 sm:$0xff] }
 0x137   : > { %v3693_v29 = vld [vmem:[%s4565_s24] ss:$0 sm:$0xff] }
 0x138   : > { %v1143_v31 = vld [vmem:[#allocation2 + $0x10] sm:$0xff]  ;;  %1154 = vadd.xlane.f32.xlu0 %v1153_v35  ;;  %s5158_s25 = scalar_lea.vmem %s5157_s9, %s4525_s27 }
 0x139   : > { %v1156_v34 = vsel %vm1149_vm3, %v1143_v31, 0.0  ;;  %3973 = vmatpush3.bf16.msra.mxu0 %v4265_v53  ;;  %3981 = vmatpush3.bf16.msra.mxu1 %v4266_v54  ;;  %v3681_v3 = vld [vmem:[%s5158_s25] ss:$0 sm:$0xff]  ;;  %s5160_s11 = scalar_lea.vmem %s5159_s23, %s4525_s27 }
 0x13a   : > { %1157 = vadd.xlane.f32.xlu1 %v1156_v34  ;;  %3986 = vmatprep.subr.bf16.mxu0 %v4267_v55  ;;  %v3682_v9 = vld [vmem:[%s5160_s11] ss:$0 sm:$0xff]  ;;  %v4269_v34 = vld [vmem:[%s4540_s28 + $0x18] sm:$0xff]   ;;  %s5164_s11 = scalar_lea.vmem %s5105_s16, %s4525_s27 }
 0x13b   : > { %3994 = vmatprep.subr.mxu1 %v4383_v18  ;;  %v4746_v51 = vld [vmem:[%s5162_s1 + $0x8] sm:$0xff] }
 0x1bd   : > { %v1152_v36 = vpop.xlane.xlu0 %1151 }
 0x1be   : > { %v1160_v38 = vmul.f32 0.03125, %v1152_v36 }
 0x1c0   : > { %v1163_v40 = vsub.f32 %v1141_v30, %v1160_v38 }
 0x1c1   : > { %v1155_v42 = vpop.xlane.xlu0 %1154 }
 0x1c2   : > { %v1161_v43 = vmul.f32 0.03125, %v1155_v42  ;;  %v1166_v44 = vmul.f32 %v1163_v40, %v1163_v40 }
 0x1c3   : > { %v1158_v37 = vpop.xlane.xlu1 %1157 }
 0x1c4   : > { %v1162_v39 = vmul.f32 0.03125, %v1158_v37  ;;  %v1164_v46 = vsub.f32 %v1142_v32, %v1161_v43  ;;  %v1169_v47 = vsel %vm1149_vm3, %v1166_v44, 0.0  ;;  %v3683_v37 = vld [vmem:[%s5161_s7] ss:$0 sm:$0xff]  ;;  %v4271_v44 = vld [vmem:[%s4560_s5 + $0x18] sm:$0xff]  }
 0x1c5   : > { %1170 = vadd.xlane.f32.xlu1 %v1169_v47  ;;  %v4740_v47 = vld [vmem:[%s5162_s1] sm:$0xff] }
 0x1c6   : > { %v1165_v41 = vsub.f32 %v1143_v31, %v1162_v39  ;;  %v1167_v49 = vmul.f32 %v1164_v46, %v1164_v46 }
 0x1c8   : > { %v1168_v45 = vmul.f32 %v1165_v41, %v1165_v41  ;;  %v1172_v50 = vsel %vm1149_vm3, %v1167_v49, 0.0 }
 0x1c9   : > { %1173 = vadd.xlane.f32.xlu0 %v1172_v50 }
 0x1ca   : > { %v1175_v48 = vsel %vm1149_vm3, %v1168_v45, 0.0 }
 0x1cb   : > { %1176 = vadd.xlane.f32.xlu1 %v1175_v48 }
 0x24e   : > { %v1171_v56 = vpop.xlane.xlu1 %1170 }
 0x24f   : > { %v1178_v57 = vmul.f32 0.03125, %v1171_v56  ;;  %v4753_v56 = vld [vmem:[%s5162_s1 + $0x10] sm:$0xff] }
 0x251   : > { %v1181_v58 = vadd.f32 1e-06, %v1178_v57 }
 0x252   : > { %v1174_v60 = vpop.xlane.xlu0 %1173 }
 0x253   : > { %4299 = vrsqrt.f32 %v1181_v58  ;;  %v1179_v62 = vmul.f32 0.03125, %v1174_v60 }
 0x254   : > { %v1177_v59 = vpop.xlane.xlu1 %1176 }
 0x255   : > { %v1180_v61 = vmul.f32 0.03125, %v1177_v59  ;;  %v1182_v0 = vadd.f32 1e-06, %v1179_v62 }
 0x257   : > { %v1183_v63 = vadd.f32 1e-06, %v1180_v61 }
 0x259   : > { %4301 = vrsqrt.f32 %v1183_v63 }
 0x25a   : > { %4303 = vrsqrt.f32 %v1182_v0 }
 0x260   : > { %v4300_v1 = vpop.eup %4299 }
 0x261   : > { %v1187_v2 = vmul.f32 %v4300_v1, %v1163_v40 }
 0x263   : > { %v1196_v7 = vmul.f32 %v3681_v3, %v1187_v2 }
 0x265   : > { %v1205_v13 = vadd.f32 %v3682_v9, %v1196_v7 }
 0x266   : > { %v4302_v4 = vpop.eup %4301 }
 0x267   : > { %v4304_v5 = vpop.eup %4303  ;;  %v1189_v6 = vmul.f32 %v4302_v4, %v1165_v41  ;;  %v4270_v41 = vld [vmem:[%s4540_s28 + $0x10] sm:$0xff]  }
 0x268   : > { %v1188_v8 = vmul.f32 %v4304_v5, %v1164_v46  ;;  %v4272_v46 = vld [vmem:[%s4560_s5 + $0x10] sm:$0xff]  }
 0x269   : > { %v1198_v10 = vmul.f32 %v3681_v3, %v1189_v6 }
 0x26a   : > { %v1197_v11 = vmul.f32 %v3681_v3, %v1188_v8 }
 0x26b   : > { %v1207_v12 = vadd.f32 %v3682_v9, %v1198_v10 }
 0x26c   : > { %v1206_v14 = vadd.f32 %v3682_v9, %v1197_v11 }
 0x26d   : > { %v4682_v15 = vpack.c.bf16 %v1207_v12, %v1207_v12 }
 0x26e   : > { %v4684_v16 = vpack.c.bf16 %v1206_v14, %v1205_v13 }
 0x270   : > { %3974 = vmatprep.mubr.msk.bf16.mxu0 %vm1149_vm3, %v4684_v16  ;;  %3982 = vmatprep.mubr.msk.bf16.mxu1 %vm1149_vm3, %v4684_v16 }
 0x271   : > { %3975 = vmatmul.mubr.msk.bf16.vlgmr.msra.gmra.mxu0 %vm1149_vm3, %v4682_v15  ;;  %3983 = vmatmul.mubr.msk.bf16.vlgmr.msra.gmra.mxu1 %vm1149_vm3, %v4682_v15 }
 0x272   : > { %3987 = vmatpush3.bf16.msra.mxu0 %v4267_v55  ;;  %3990 = vmatprep.mubr.msk.bf16.mxu0 %vm1149_vm3, %v4684_v16 }
 0x273   : > { %3988 = vmatprep.subr.bf16.mxu0 %v4268_v17  ;;  %4000 = vmatprep.mubr.msk.f32.mxu1 %vm4384_vm4, %v4383_v18 }
 0x276   : > { %3989 = vmatpush3.bf16.msra.mxu0 %v4268_v17 }
 0x277   : > { %4009 = vmatprep.subr.mxu0 %v4383_v18 }
 0x279   : > { %3991 = vmatmul.mubr.msk.bf16.vlgmr.msra.gmra.mxu0 %vm1149_vm3, %v4682_v15 }
 0x27a   : > { %4015 = vmatprep.mubr.msk.f32.mxu0 %vm4384_vm4, %v4383_v18 }
 0x331   : > { %v3976_v20 = vpop.f32.mrf.mxu0  ;;  %v3984_v21 = vpop.f32.mrf.mxu1 }
 0x332   : > { %v1353_v22 = vadd.f32 %v3984_v21, %v3688_v19  ;;  %v1282_v45 = vadd.f32 %v3976_v20, %v3683_v37 }
 0x333   : > { %v1273_v23 = vpop.f32.mrf.mxu0  ;;  %v1344_v24 = vpop.f32.mrf.mxu1 }
 0x334   : > { %3995 = vmatpush3.xpose.msk.msra.mxu1 %vm1429_vm5, %v1353_v22  ;;  %v1345_v35 = vadd.f32 %v3688_v19, %v1344_v24  ;;  %v1274_v38 = vadd.f32 %v3683_v37, %v1273_v23  ;;  %v4273_v23 = vld [vmem:[%s4550_s29 + $0x18] sm:$0xff]  }
 0x335   : > { %v3977_v25 = vpop.f32.mrf.mxu0  ;;  %v3985_v26 = vpop.f32.mrf.mxu1  ;;  %3996 = vmatprep.subr.mxu1 %v4383_v18 }
 0x337   : > { %v1276_v27 = vpop.f32.mrf.mxu0  ;;  %v1347_v28 = vpop.f32.mrf.mxu1 }
 0x338   : > { %v1348_v30 = vadd.f32 %v3688_v19, %v1347_v28  ;;  %v1277_v43 = vadd.f32 %v3683_v37, %v1276_v27  ;;  %v4278_v37 = vld [vmem:[%s4560_s5 + $0x20] sm:$0xff]  }
 0x339   : > { %v3992_v31 = vpop.f32.mrf.mxu0 }
 0x33a   : > { %v1424_v32 = vadd.f32 %v3992_v31, %v3693_v29  ;;  %3997 = vmatpush3.xpose.msk.msra.mxu1 %vm1429_vm5, %v1348_v30 }
 0x33b   : > { %v1415_v33 = vpop.f32.mrf.mxu0  ;;  %3998 = vmatprep.subr.mxu1 %v4383_v18 }
 0x33c   : > { %4010 = vmatpush3.msra.mxu0 %v1424_v32  ;;  %v1416_v42 = vadd.f32 %v3693_v29, %v1415_v33  ;;  %v4275_v32 = vld [vmem:[%s4540_s28 + $0x28] sm:$0xff]  }
 0x33d   : > { %v3993_v36 = vpop.f32.mrf.mxu0  ;;  %4011 = vmatprep.subr.mxu0 %v4383_v18 }
 0x33e   : > { %3999 = vmatpush3.xpose.msk.msra.mxu1 %vm1429_vm5, %v1345_v35  ;;  %v4276_v35 = vld [vmem:[%s4540_s28 + $0x20] sm:$0xff]   ;;  %v4277_v36 = vld [vmem:[%s4560_s5 + $0x28] sm:$0xff]  }
 0x33f   : > { %v1418_v39 = vpop.f32.mrf.mxu0  ;;  %4024 = vmatprep.subr.bf16.mxu1 %v4269_v34 }
 0x340   : > { %v1419_v40 = vadd.f32 %v3693_v29, %v1418_v39  ;;  %v4274_v29 = vld [vmem:[%s4550_s29 + $0x10] sm:$0xff]  }
 0x341   : > { %4001 = vmatmul.mubr.msk.f32.vlgmr.msra.gmra.mxu1 %vm1429_vm5, %v1274_v38 }
 0x342   : > { %4012 = vmatpush3.msra.mxu0 %v1419_v40  ;;  %4003 = vmatprep.mubr.msk.f32.mxu1 %vm4384_vm4, %v4383_v18 }
 0x343   : > { %4013 = vmatprep.subr.mxu0 %v4383_v18  ;;  %4025 = vmatpush3.bf16.msra.mxu1 %v4269_v34 }
 0x344   : > { %4014 = vmatpush3.msra.mxu0 %v1416_v42  ;;  %4026 = vmatprep.subr.bf16.mxu1 %v4270_v41 }
 0x345   : > { %4004 = vmatmul.mubr.msk.f32.gmra.mxu1 %vm1429_vm5, %v1277_v43  ;;  %4032 = vmatprep.subr.bf16.mxu0 %v4273_v23 }
 0x346   : > { %4006 = vmatprep.mubr.msk.f32.mxu1 %vm4384_vm4, %v4383_v18 }
 0x347   : > { %4027 = vmatpush3.bf16.msra.mxu1 %v4270_v41 }
 0x348   : > { %4040 = vmatprep.subr.bf16.mxu1 %v4271_v44 }
 0x349   : > { %4007 = vmatmul.mubr.msk.f32.gmra.mxu1 %vm1429_vm5, %v1282_v45 }
 0x34a   : > { %4028 = vmatprep.mubr.msk.bf16.mxu1 %vm1149_vm3, %v4684_v16 }
 0x34d   : > { %4029 = vmatmul.mubr.msk.bf16.vlgmr.msra.gmra.mxu1 %vm1149_vm3, %v4682_v15 }
 0x34e   : > { %4041 = vmatpush3.bf16.msra.mxu1 %v4271_v44  ;;  %4044 = vmatprep.mubr.msk.bf16.mxu1 %vm1149_vm3, %v4684_v16  ;;  %v3722_v44 = vld [vmem:[%s4555_s30 + $0x1] ss:$0 sm:$0xff] }
 0x34f   : > { %4042 = vmatprep.subr.bf16.mxu1 %v4272_v46 }
 0x352   : > { %4043 = vmatpush3.bf16.msra.mxu1 %v4272_v46 }
 0x353   : > { %4048 = vmatprep.subr.mxu1 %v4383_v18 }
 0x355   : > { %4045 = vmatmul.mubr.msk.bf16.vlgmr.msra.gmra.mxu1 %vm1149_vm3, %v4682_v15 }
 0x356   : > { %4054 = vmatprep.mubr.msk.f32.mxu1 %vm4384_vm4, %v4383_v18 }
 0x401   : > { %v1514_v48 = vpop.f32.mrf.mxu1 }
 0x402   : > { %v1515_v49 = vadd.f32 %v1514_v48, %v4740_v47 }
 0x403   : > { %v4002_v50 = vpop.f32.mrf.mxu1 }
 0x404   : > { %v1529_v52 = vsel %vm1528_vm6, %v1515_v49, -inf }
 0x405   : > { %1530 = vmax.xlane.f32.xlu0 %v1529_v52  ;;  %v1519_v53 = vpop.f32.mrf.mxu1 }
 0x406   : > { %v1520_v54 = vadd.f32 %v1519_v53, %v4746_v51 }
 0x407   : > { %v4005_v55 = vpop.f32.mrf.mxu1 }
 0x408   : > { %v1532_v57 = vsel %vm1528_vm6, %v1520_v54, -inf }
 0x409   : > { %1533 = vmax.xlane.f32.xlu1 %v1532_v57  ;;  %v1524_v58 = vpop.f32.mrf.mxu1  ;;  %v3732_v57 = vld [vmem:[%s4565_s24 + $0x1] ss:$0 sm:$0xff] }
 0x40a   : > { %v1525_v59 = vadd.f32 %v1524_v58, %v4753_v56 }
 0x40b   : > { %v4008_v60 = vpop.f32.mrf.mxu1 }
 0x40c   : > { %v1535_v61 = vsel %vm1528_vm6, %v1525_v59, -inf }
 0x40d   : > { %1536 = vmax.xlane.f32.xlu0 %v1535_v61  ;;  %v4758_v62 = vpop.f32.mrf.mxu1 }
 0x40f   : > { %v4760_v63 = vpop.f32.mrf.mxu1 }
 0x411   : > { %v4031_v0 = vpop.f32.mrf.mxu1 }
 0x413   : > { %v4762_v1 = vpop.f32.mrf.mxu1 }
 0x415   : > { %v4764_v2 = vpop.f32.mrf.mxu1 }
 0x417   : > { %v4766_v3 = vpop.f32.mrf.mxu1 }
 0x419   : > { %v4047_v4 = vpop.f32.mrf.mxu1 }
 0x41a   : > { %v3771_v4 = vld [vmem:[%s4565_s24 + $0x2] ss:$0 sm:$0xff] }
 0x41b   : > { %v1859_v61 = vpop.f32.mrf.mxu1 }
 0x48e   : > { %v1531_v5 = vpop.xlane.xlu0 %1530 }
 0x48f   : > { %v1538_v6 = vsub.f32 %v1515_v49, %v1531_v5  ;;  %v1865_v5 = vadd.f32 %v4764_v2, %v3732_v57 }
 0x491   : > { %v1541_v7 = vmul.f32 1.442695, %v1538_v6 }
 0x492   : > { %v1534_v8 = vpop.xlane.xlu1 %1533 }
 0x493   : > { %4305 = vpow2.f32 %v1541_v7  ;;  %v1539_v9 = vsub.f32 %v1520_v54, %v1534_v8  ;;  %v1860_v7 = vadd.f32 %v3732_v57, %v1859_v61 }
 0x495   : > { %v1543_v10 = vmul.f32 1.442695, %v1539_v9 }
 0x496   : > { %v1537_v11 = vpop.xlane.xlu0 %1536 }
 0x497   : > { %4307 = vpow2.f32 %v1543_v10  ;;  %v1540_v12 = vsub.f32 %v1525_v59, %v1537_v11  ;;  %v3712_v59 = vld [vmem:[%s5161_s7 + $0x1] ss:$0 sm:$0xff]  ;;  %v1857_v10 = vadd.f32 %v3732_v57, %v4766_v3 }
 0x498   : > { %v1711_v60 = vadd.f32 %v3712_v59, %v4760_v63  ;;  %v1714_v9 = vadd.f32 %v3712_v59, %v4762_v1  ;;  %v1719_v11 = vadd.f32 %v4758_v62, %v3712_v59 }
 0x499   : > { %v1545_v13 = vmul.f32 1.442695, %v1540_v12 }
 0x49b   : > { %4309 = vpow2.f32 %v1545_v13 }
 0x4a0   : > { %v4306_v14 = vpop.eup %4305 }
 0x4a1   : > { %v1547_v17 = vsel %vm1528_vm6, %v4306_v14, 0.0 }
 0x4a2   : > { %1548 = vadd.xlane.f32.xlu1 %v1547_v17 }
 0x4a4   : > { %v4308_v19 = vpop.eup %4307 }
 0x4a5   : > { %v1550_v20 = vsel %vm1528_vm6, %v4308_v19, 0.0 }
 0x4a6   : > { %1551 = vadd.xlane.f32.xlu0 %v1550_v20 }
 0x4a8   : > { %v4310_v21 = vpop.eup %4309 }
 0x4a9   : > { %v1553_v22 = vsel %vm1528_vm6, %v4310_v21, 0.0 }
 0x4aa   : > { %1554 = vadd.xlane.f32.xlu1 %v1553_v22 }
 0x52b   : > { %v1549_v24 = vpop.xlane.xlu1 %1548 }
 0x52c   : > { %4311 = vrcp.f32 %v1549_v24 }
 0x52f   : > { %v1552_v25 = vpop.xlane.xlu0 %1551 }
 0x530   : > { %4313 = vrcp.f32 %v1552_v25 }
 0x533   : > { %v1555_v26 = vpop.xlane.xlu1 %1554 }
 0x534   : > { %4315 = vrcp.f32 %v1555_v26 }
 0x539   : > { %v4312_v27 = vpop.eup %4311 }
 0x53a   : > { %v1559_v28 = vmul.f32 %v4312_v27, %v4306_v14 }
 0x53c   : > { %4016 = vmatmul.mubr.msk.f32.vlgmr.msra.gmra.mxu0 %vm1528_vm6, %v1559_v28 }
 0x53d   : > { %v4314_v30 = vpop.eup %4313  ;;  %4033 = vmatpush3.bf16.msra.mxu0 %v4273_v23  ;;  %4018 = vmatprep.mubr.msk.f32.mxu0 %vm4384_vm4, %v4383_v18 }
 0x53e   : > { %v1560_v31 = vmul.f32 %v4314_v30, %v4308_v19  ;;  %4034 = vmatprep.subr.bf16.mxu0 %v4274_v29 }
 0x540   : > { %4019 = vmatmul.mubr.msk.f32.gmra.mxu0 %vm1528_vm6, %v1560_v31 }
 0x541   : > { %v4316_v33 = vpop.eup %4315  ;;  %4035 = vmatpush3.bf16.msra.mxu0 %v4274_v29  ;;  %4021 = vmatprep.mubr.msk.f32.mxu0 %vm4384_vm4, %v4383_v18 }
 0x542   : > { %v1561_v34 = vmul.f32 %v4316_v33, %v4310_v21  ;;  %4078 = vmatprep.subr.bf16.mxu0 %v4275_v32 }
 0x544   : > { %4022 = vmatmul.mubr.msk.f32.gmra.mxu0 %vm1528_vm6, %v1561_v34 }
 0x545   : > { %4036 = vmatprep.mubr.msk.bf16.mxu0 %vm1149_vm3, %v4684_v16 }
 0x548   : > { %4037 = vmatmul.mubr.msk.bf16.vlgmr.msra.gmra.mxu0 %vm1149_vm3, %v4682_v15 }
 0x549   : > { %4079 = vmatpush3.bf16.msra.mxu0 %v4275_v32  ;;  %4082 = vmatprep.mubr.msk.bf16.mxu0 %vm1149_vm3, %v4684_v16 }
 0x54a   : > { %4080 = vmatprep.subr.bf16.mxu0 %v4276_v35 }
 0x54d   : > { %4081 = vmatpush3.bf16.msra.mxu0 %v4276_v35 }
 0x54e   : > { %4094 = vmatprep.subr.bf16.mxu0 %v4277_v36 }
 0x550   : > { %4083 = vmatmul.mubr.msk.bf16.vlgmr.msra.gmra.mxu0 %vm1149_vm3, %v4682_v15 }
 0x551   : > { %4095 = vmatpush3.bf16.msra.mxu0 %v4277_v36  ;;  %4098 = vmatprep.mubr.msk.bf16.mxu0 %vm1149_vm3, %v4684_v16 }
 0x552   : > { %4096 = vmatprep.subr.bf16.mxu0 %v4278_v37 }
 0x555   : > { %4097 = vmatpush3.bf16.msra.mxu0 %v4278_v37 }
 0x556   : > { %4117 = vmatprep.subr.mxu0 %v4383_v18 }
 0x558   : > { %4099 = vmatmul.mubr.msk.bf16.vlgmr.msra.gmra.mxu0 %vm1149_vm3, %v4682_v15 }
 0x559   : > { %4123 = vmatprep.mubr.msk.f32.mxu0 %vm4384_vm4, %v4383_v18 }
 0x5fc   : > { %v4799_v38 = vpop.f32.mrf.mxu0 }
 0x5fe   : > { %v4017_v39 = vpop.f32.mrf.mxu0 }
 0x600   : > { %v4801_v40 = vpop.f32.mrf.mxu0 }
 0x602   : > { %v4020_v41 = vpop.f32.mrf.mxu0 }
 0x604   : > { %v4803_v42 = vpop.f32.mrf.mxu0 }
 0x606   : > { %v4023_v43 = vpop.f32.mrf.mxu0 }
 0x608   : > { %v4038_v45 = vpop.f32.mrf.mxu0 }
 0x609   : > { %v1792_v46 = vadd.f32 %v4038_v45, %v3722_v44  ;;  %v4279_v45 = vld [vmem:[%s4550_s29 + $0x28] sm:$0xff]  }
 0x60a   : > { %v1783_v48 = vpop.f32.mrf.mxu0 }
 0x60b   : > { %4049 = vmatpush3.xpose.msk.msra.mxu1 %vm1429_vm5, %v1792_v46  ;;  %v1784_v55 = vadd.f32 %v3722_v44, %v1783_v48 }
 0x60c   : > { %v4039_v49 = vpop.f32.mrf.mxu0  ;;  %4050 = vmatprep.subr.mxu1 %v4383_v18 }
 0x60e   : > { %v1786_v50 = vpop.f32.mrf.mxu0 }
 0x60f   : > { %v1787_v52 = vadd.f32 %v3722_v44, %v1786_v50 }
 0x610   : > { %v4808_v53 = vpop.f32.mrf.mxu0 }
 0x611   : > { %4051 = vmatpush3.xpose.msk.msra.mxu1 %vm1429_vm5, %v1787_v52 }
 0x612   : > { %v4811_v54 = vpop.f32.mrf.mxu0  ;;  %4052 = vmatprep.subr.mxu1 %v4383_v18 }
 0x614   : > { %v4085_v58 = vpop.f32.mrf.mxu0 }
 0x615   : > { %4053 = vmatpush3.xpose.msk.msra.mxu1 %vm1429_vm5, %v1784_v55  ;;  %v4280_v55 = vld [vmem:[%s4550_s29 + $0x20] sm:$0xff]  }
 0x616   : > { %v4818_v0 = vpop.f32.mrf.mxu0  ;;  %4063 = vmatprep.subr.mxu1 %v4383_v18 }
 0x618   : > { %4055 = vmatmul.mubr.msk.f32.vlgmr.msra.gmra.mxu1 %vm1429_vm5, %v1711_v60  ;;  %v4100_v6 = vpop.f32.mrf.mxu0 }
 0x619   : > { %v2304_v8 = vadd.f32 %v4100_v6, %v3771_v4  ;;  %4064 = vmatpush3.msra.mxu1 %v1865_v5  ;;  %4057 = vmatprep.mubr.msk.f32.mxu1 %vm4384_vm4, %v4383_v18 }
 0x61a   : > { %4065 = vmatprep.subr.mxu1 %v4383_v18  ;;  %v2295_v63 = vpop.f32.mrf.mxu0 }
 0x61b   : > { %4066 = vmatpush3.msra.mxu1 %v1860_v7  ;;  %4118 = vmatpush3.msra.mxu0 %v2304_v8  ;;  %v2296_v3 = vadd.f32 %v3771_v4, %v2295_v63  ;;  %v3761_v63 = vld [vmem:[%s4555_s30 + $0x2] ss:$0 sm:$0xff] }
 0x61c   : > { %4058 = vmatmul.mubr.msk.f32.gmra.mxu1 %vm1429_vm5, %v1714_v9  ;;  %4067 = vmatprep.subr.mxu1 %v4383_v18  ;;  %v4101_v2 = vpop.f32.mrf.mxu0 }
 0x61d   : > { %4068 = vmatpush3.msra.mxu1 %v1857_v10  ;;  %4060 = vmatprep.mubr.msk.f32.mxu1 %vm4384_vm4, %v4383_v18 }
 0x61e   : > { %v2298_v12 = vpop.f32.mrf.mxu0  ;;  %4119 = vmatprep.subr.mxu0 %v4383_v18  ;;  %4086 = vmatprep.subr.bf16.mxu1 %v4279_v45 }
 0x61f   : > { %v2299_v1 = vadd.f32 %v3771_v4, %v2298_v12 }
 0x620   : > { %4061 = vmatmul.mubr.msk.f32.gmra.mxu1 %vm1429_vm5, %v1719_v11 }
 0x621   : > { %4120 = vmatpush3.msra.mxu0 %v2299_v1  ;;  %4069 = vmatprep.mubr.msk.f32.mxu1 %vm4384_vm4, %v4383_v18 }
 0x622   : > { %4121 = vmatprep.subr.mxu0 %v4383_v18 }
 0x623   : > { %4122 = vmatpush3.msra.mxu0 %v2296_v3 }
 0x6d8   : > { %v1954_v13 = vpop.f32.mrf.mxu1 }
 0x6d9   : > { %v1955_v14 = vadd.f32 %v1954_v13, %v4740_v47  ;;  %v4281_v13 = vld [vmem:[%s4540_s28 + $0x38] sm:$0xff]  }
 0x6da   : > { %v4056_v17 = vpop.f32.mrf.mxu1 }
 0x6db   : > { %v1968_v62 = vsel %vm1528_vm6, %v1955_v14, -inf  ;;  %v3751_v17 = vld [vmem:[%s5161_s7 + $0x2] ss:$0 sm:$0xff] }
 0x6dc   : > { %1969 = vmax.xlane.f32.xlu0 %v1968_v62  ;;  %v1959_v19 = vpop.f32.mrf.mxu1  ;;  %v2150_v62 = vadd.f32 %v3751_v17, %v4811_v54  ;;  %v2158_v54 = vadd.f32 %v4808_v53, %v3751_v17 }
 0x6dd   : > { %v1960_v20 = vadd.f32 %v1959_v19, %v4746_v51  ;;  %v4282_v19 = vld [vmem:[%s4540_s28 + $0x30] sm:$0xff]   ;;  %s4386_s28 = smov 16  }
 0x6de   : > { %v4059_v21 = vpop.f32.mrf.mxu1 }
 0x6df   : > { %v1971_v22 = vsel %vm1528_vm6, %v1960_v20, -inf  ;;  %v4283_v21 = vld [vmem:[%s4560_s5 + $0x38] sm:$0xff]  }
 0x6e0   : > { %1972 = vmax.xlane.f32.xlu1 %v1971_v22  ;;  %v1964_v23 = vpop.f32.mrf.mxu1  ;;  %v4284_v22 = vld [vmem:[%s4560_s5 + $0x30] sm:$0xff]  }
 0x6e1   : > { %v1965_v24 = vadd.f32 %v1964_v23, %v4753_v56 }
 0x6e2   : > { %v4062_v25 = vpop.f32.mrf.mxu1 }
 0x6e3   : > { %v1974_v26 = vsel %vm1528_vm6, %v1965_v24, -inf }
 0x6e4   : > { %1975 = vmax.xlane.f32.xlu0 %v1974_v26 }
 0x765   : > { %v1970_v27 = vpop.xlane.xlu0 %1969 }
 0x766   : > { %v1977_v28 = vsub.f32 %v1955_v14, %v1970_v27 }
 0x768   : > { %v1980_v29 = vmul.f32 1.442695, %v1977_v28 }
 0x769   : > { %v1973_v30 = vpop.xlane.xlu1 %1972 }
 0x76a   : > { %4317 = vpow2.f32 %v1980_v29  ;;  %v1978_v31 = vsub.f32 %v1960_v20, %v1973_v30  ;;  %v2153_v20 = vadd.f32 %v3751_v17, %v4818_v0 }
 0x76c   : > { %v1982_v32 = vmul.f32 1.442695, %v1978_v31 }
 0x76d   : > { %v1976_v33 = vpop.xlane.xlu0 %1975 }
 0x76e   : > { %4319 = vpow2.f32 %v1982_v32  ;;  %v1979_v34 = vsub.f32 %v1965_v24, %v1976_v33 }
 0x770   : > { %v1984_v35 = vmul.f32 1.442695, %v1979_v34 }
 0x772   : > { %4321 = vpow2.f32 %v1984_v35 }
 0x777   : > { %v4318_v36 = vpop.eup %4317 }
 0x778   : > { %v1986_v37 = vsel %vm1528_vm6, %v4318_v36, 0.0 }
 0x779   : > { %1987 = vadd.xlane.f32.xlu1 %v1986_v37  ;;  %v3810_v37 = vld [vmem:[%s4565_s24 + $0x3] ss:$0 sm:$0xff] }
 0x77b   : > { %v4320_v39 = vpop.eup %4319 }
 0x77c   : > { %v1989_v41 = vsel %vm1528_vm6, %v4320_v39, 0.0 }
 0x77d   : > { %1990 = vadd.xlane.f32.xlu0 %v1989_v41 }
 0x77f   : > { %v4322_v43 = vpop.eup %4321 }
 0x780   : > { %v1992_v44 = vsel %vm1528_vm6, %v4322_v43, 0.0 }
 0x781   : > { %1993 = vadd.xlane.f32.xlu1 %v1992_v44 }
 0x802   : > { %v1988_v46 = vpop.xlane.xlu1 %1987 }
 0x803   : > { %4323 = vrcp.f32 %v1988_v46 }
 0x806   : > { %v1991_v48 = vpop.xlane.xlu0 %1990 }
 0x807   : > { %4325 = vrcp.f32 %v1991_v48 }
 0x80a   : > { %v1994_v49 = vpop.xlane.xlu1 %1993 }
 0x80b   : > { %4327 = vrcp.f32 %v1994_v49 }
 0x810   : > { %v4324_v50 = vpop.eup %4323 }
 0x811   : > { %v1998_v52 = vmul.f32 %v4324_v50, %v4318_v36 }
 0x813   : > { %4070 = vmatmul.mubr.msk.f32.vlgmr.msra.gmra.mxu1 %vm1528_vm6, %v1998_v52 }
 0x814   : > { %v4326_v57 = vpop.eup %4325  ;;  %4087 = vmatpush3.bf16.msra.mxu1 %v4279_v45  ;;  %4072 = vmatprep.mubr.msk.f32.mxu1 %vm4384_vm4, %v4383_v18 }
 0x815   : > { %v1999_v58 = vmul.f32 %v4326_v57, %v4320_v39  ;;  %4088 = vmatprep.subr.bf16.mxu1 %v4280_v55 }
 0x817   : > { %4073 = vmatmul.mubr.msk.f32.gmra.mxu1 %vm1528_vm6, %v1999_v58 }
 0x818   : > { %v4328_v59 = vpop.eup %4327  ;;  %4089 = vmatpush3.bf16.msra.mxu1 %v4280_v55  ;;  %4075 = vmatprep.mubr.msk.f32.mxu1 %vm4384_vm4, %v4383_v18 }
 0x819   : > { %v2000_v60 = vmul.f32 %v4328_v59, %v4322_v43  ;;  %4102 = vmatprep.subr.mxu1 %v4383_v18 }
 0x81b   : > { %4076 = vmatmul.mubr.msk.f32.gmra.mxu1 %vm1528_vm6, %v2000_v60 }
 0x81c   : > { %4090 = vmatprep.mubr.msk.bf16.mxu1 %vm1149_vm3, %v4684_v16 }
 0x81f   : > { %4091 = vmatmul.mubr.msk.bf16.vlgmr.msra.gmra.mxu1 %vm1149_vm3, %v4682_v15 }
 0x820   : > { %4108 = vmatprep.mubr.msk.f32.mxu1 %vm4384_vm4, %v4383_v18 }
 0x8d3   : > { %v4864_v61 = vpop.f32.mrf.mxu1 }
 0x8d5   : > { %v4071_v4 = vpop.f32.mrf.mxu1 }
 0x8d7   : > { %v4866_v5 = vpop.f32.mrf.mxu1 }
 0x8d8   : > { %v4248_v6 = vpack.i.bf16 %v4866_v5, %v4864_v61 }
 0x8d9   : > { %v4074_v7 = vpop.f32.mrf.mxu1 }
 0x8db   : > { %v4870_v8 = vpop.f32.mrf.mxu1 }
 0x8dd   : > { %v4077_v9 = vpop.f32.mrf.mxu1 }
 0x8df   : > { %v4092_v10 = vpop.f32.mrf.mxu1 }
 0x8e0   : > { %v2231_v2 = vadd.f32 %v4092_v10, %v3761_v63 }
 0x8e1   : > { %v2222_v11 = vpop.f32.mrf.mxu1 }
 0x8e2   : > { %4103 = vmatpush3.xpose.msk.msra.mxu1 %vm1429_vm5, %v2231_v2  ;;  %v2223_v14 = vadd.f32 %v3761_v63, %v2222_v11 }
 0x8e3   : > { %v4093_v12 = vpop.f32.mrf.mxu1  ;;  %4104 = vmatprep.subr.mxu1 %v4383_v18 }
 0x8e4   : > { %v4285_v12 = vld [vmem:[%s4550_s29 + $0x38] sm:$0xff]  }
 0x8e5   : > { %v2225_v1 = vpop.f32.mrf.mxu1  ;;  %4140 = vmatprep.subr.bf16.mxu0 %v4285_v12 }
 0x8e6   : > { %v2226_v3 = vadd.f32 %v3761_v63, %v2225_v1 }
 0x8e8   : > { %4105 = vmatpush3.xpose.msk.msra.mxu1 %vm1429_vm5, %v2226_v3 }
 0x8e9   : > { %4106 = vmatprep.subr.mxu1 %v4383_v18 }
 0x8ec   : > { %4107 = vmatpush3.xpose.msk.msra.mxu1 %vm1429_vm5, %v2223_v14 }
 0x8ed   : > { %4132 = vmatprep.subr.bf16.mxu1 %v4281_v13 }
 0x8ef   : > { %4109 = vmatmul.mubr.msk.f32.vlgmr.msra.gmra.mxu1 %vm1429_vm5, %v2150_v62  ;;  %v4286_v62 = vld [vmem:[%s4550_s29 + $0x30] sm:$0xff]   ;;  %s4385_s29 = smov 8  }
 0x8f0   : > { %4111 = vmatprep.mubr.msk.f32.mxu1 %vm4384_vm4, %v4383_v18  ;;  %4133 = vmatpush3.bf16.msra.mxu1 %v4281_v13 }
 0x8f1   : > { %4134 = vmatprep.subr.bf16.mxu1 %v4282_v19 }
 0x8f3   : > { %4112 = vmatmul.mubr.msk.f32.gmra.mxu1 %vm1429_vm5, %v2153_v20 }
 0x8f4   : > { %4114 = vmatprep.mubr.msk.f32.mxu1 %vm4384_vm4, %v4383_v18  ;;  %4135 = vmatpush3.bf16.msra.mxu1 %v4282_v19 }
 0x8f5   : > { %4148 = vmatprep.subr.bf16.mxu1 %v4283_v21 }
 0x8f7   : > { %4115 = vmatmul.mubr.msk.f32.gmra.mxu1 %vm1429_vm5, %v2158_v54 }
 0x8f8   : > { %4136 = vmatprep.mubr.msk.bf16.mxu1 %vm1149_vm3, %v4684_v16 }
 0x8fb   : > { %4137 = vmatmul.mubr.msk.bf16.vlgmr.msra.gmra.mxu1 %vm1149_vm3, %v4682_v15 }
 0x8fc   : > { %4149 = vmatpush3.bf16.msra.mxu1 %v4283_v21  ;;  %4152 = vmatprep.mubr.msk.bf16.mxu1 %vm1149_vm3, %v4684_v16 }
 0x8fd   : > { %4150 = vmatprep.subr.bf16.mxu1 %v4284_v22 }
 0x900   : > { %4151 = vmatpush3.bf16.msra.mxu1 %v4284_v22 }
 0x901   : > { %4171 = vmatprep.subr.mxu1 %v4383_v18 }
 0x903   : > { %4153 = vmatmul.mubr.msk.bf16.vlgmr.msra.gmra.mxu1 %vm1149_vm3, %v4682_v15 }
 0x904   : > { %4177 = vmatprep.mubr.msk.f32.mxu1 %vm4384_vm4, %v4383_v18 }
 0x9af   : > { %v2393_v53 = vpop.f32.mrf.mxu1 }
 0x9b0   : > { %v2394_v0 = vadd.f32 %v2393_v53, %v4740_v47 }
 0x9b1   : > { %v4110_v23 = vpop.f32.mrf.mxu1 }
 0x9b2   : > { %v2407_v24 = vsel %vm1528_vm6, %v2394_v0, -inf }
 0x9b3   : > { %2408 = vmax.xlane.f32.xlu0 %v2407_v24  ;;  %v2398_v25 = vpop.f32.mrf.mxu1 }
 0x9b4   : > { %v2399_v26 = vadd.f32 %v2398_v25, %v4746_v51 }
 0x9b5   : > { %v4113_v27 = vpop.f32.mrf.mxu1 }
 0x9b6   : > { %v2410_v28 = vsel %vm1528_vm6, %v2399_v26, -inf }
 0x9b7   : > { %2411 = vmax.xlane.f32.xlu1 %v2410_v28  ;;  %v2403_v29 = vpop.f32.mrf.mxu1 }
 0x9b8   : > { %v2404_v30 = vadd.f32 %v2403_v29, %v4753_v56 }
 0x9b9   : > { %v4116_v31 = vpop.f32.mrf.mxu1 }
 0x9ba   : > { %v2413_v32 = vsel %vm1528_vm6, %v2404_v30, -inf }
 0x9bb   : > { %2414 = vmax.xlane.f32.xlu0 %v2413_v32  ;;  %v4910_v33 = vpop.f32.mrf.mxu1 }
 0x9bd   : > { %v4912_v34 = vpop.f32.mrf.mxu1 }
 0x9bf   : > { %v4139_v35 = vpop.f32.mrf.mxu1 }
 0x9c0   : > { %v3790_v35 = vld [vmem:[%s5161_s7 + $0x3] ss:$0 sm:$0xff] }
 0x9c1   : > { %v4914_v36 = vpop.f32.mrf.mxu1 }
 0x9c3   : > { %v4154_v39 = vpop.f32.mrf.mxu1 }
 0x9c4   : > { %v2743_v41 = vadd.f32 %v4154_v39, %v3810_v37  ;;  %v2592_v39 = vadd.f32 %v3790_v35, %v4914_v36 }
 0x9c5   : > { %v2734_v43 = vpop.f32.mrf.mxu1 }
 0x9c6   : > { %4172 = vmatpush3.msra.mxu1 %v2743_v41  ;;  %v2735_v48 = vadd.f32 %v3810_v37, %v2734_v43  ;;  %v2597_v41 = vadd.f32 %v4910_v33, %v3790_v35 }
 0x9c7   : > { %v4155_v44 = vpop.f32.mrf.mxu1  ;;  %4173 = vmatprep.subr.mxu1 %v4383_v18 }
 0x9c9   : > { %v2737_v45 = vpop.f32.mrf.mxu1 }
 0x9ca   : > { %v2738_v46 = vadd.f32 %v3810_v37, %v2737_v45  ;;  %v2589_v37 = vadd.f32 %v3790_v35, %v4912_v34 }
 0x9cc   : > { %4174 = vmatpush3.msra.mxu1 %v2738_v46 }
 0x9cd   : > { %4175 = vmatprep.subr.mxu1 %v4383_v18 }
 0x9ce   : > { %4176 = vmatpush3.msra.mxu1 %v2735_v48 }
 0xa3c   : > { %v2409_v49 = vpop.xlane.xlu0 %2408 }
 0xa3d   : > { %v2416_v50 = vsub.f32 %v2394_v0, %v2409_v49 }
 0xa3f   : > { %v2419_v52 = vmul.f32 1.442695, %v2416_v50 }
 0xa40   : > { %v2412_v55 = vpop.xlane.xlu1 %2411 }
 0xa41   : > { %4329 = vpow2.f32 %v2419_v52  ;;  %v2417_v57 = vsub.f32 %v2399_v26, %v2412_v55 }
 0xa43   : > { %v2421_v58 = vmul.f32 1.442695, %v2417_v57 }
 0xa44   : > { %v2415_v59 = vpop.xlane.xlu0 %2414 }
 0xa45   : > { %4331 = vpow2.f32 %v2421_v58  ;;  %v2418_v60 = vsub.f32 %v2404_v30, %v2415_v59 }
 0xa47   : > { %v2423_v4 = vmul.f32 1.442695, %v2418_v60 }
 0xa49   : > { %4333 = vpow2.f32 %v2423_v4 }
 0xa4e   : > { %v4330_v7 = vpop.eup %4329 }
 0xa4f   : > { %v2425_v9 = vsel %vm1528_vm6, %v4330_v7, 0.0 }
 0xa50   : > { %2426 = vadd.xlane.f32.xlu1 %v2425_v9 }
 0xa52   : > { %v4332_v63 = vpop.eup %4331 }
 0xa53   : > { %v2428_v10 = vsel %vm1528_vm6, %v4332_v63, 0.0 }
 0xa54   : > { %2429 = vadd.xlane.f32.xlu0 %v2428_v10 }
 0xa56   : > { %v4334_v2 = vpop.eup %4333 }
 0xa57   : > { %v2431_v11 = vsel %vm1528_vm6, %v4334_v2, 0.0 }
 0xa58   : > { %2432 = vadd.xlane.f32.xlu1 %v2431_v11 }
 0xad9   : > { %v2427_v1 = vpop.xlane.xlu1 %2426 }
 0xada   : > { %4335 = vrcp.f32 %v2427_v1 }
 0xadd   : > { %v2430_v3 = vpop.xlane.xlu0 %2429 }
 0xade   : > { %4337 = vrcp.f32 %v2430_v3 }
 0xae1   : > { %v2433_v13 = vpop.xlane.xlu1 %2432 }
 0xae2   : > { %4339 = vrcp.f32 %v2433_v13 }
 0xae7   : > { %v4336_v14 = vpop.eup %4335 }
 0xae8   : > { %v2437_v17 = vmul.f32 %v4336_v14, %v4330_v7 }
 0xaea   : > { %4124 = vmatmul.mubr.msk.f32.vlgmr.msra.gmra.mxu0 %vm1528_vm6, %v2437_v17 }
 0xaeb   : > { %v4338_v19 = vpop.eup %4337  ;;  %4141 = vmatpush3.bf16.msra.mxu0 %v4285_v12  ;;  %4126 = vmatprep.mubr.msk.f32.mxu0 %vm4384_vm4, %v4383_v18 }
 0xaec   : > { %v2438_v20 = vmul.f32 %v4338_v19, %v4332_v63  ;;  %4142 = vmatprep.subr.bf16.mxu0 %v4286_v62  ;;  %v4288_v19 = vld [vmem:[%s4575_s0] sm:$0xff]  }
 0xaee   : > { %4127 = vmatmul.mubr.msk.f32.gmra.mxu0 %vm1528_vm6, %v2438_v20 }
 0xaef   : > { %v4340_v21 = vpop.eup %4339  ;;  %4143 = vmatpush3.bf16.msra.mxu0 %v4286_v62  ;;  %4129 = vmatprep.mubr.msk.f32.mxu0 %vm4384_vm4, %v4383_v18  ;;  %v4287_v62 = vld [vmem:[%s4575_s0 + $0x8] sm:$0xff]   ;;  %s5163_s0 = scalar_lea.vmem %s5104_s15, %s4525_s27  ;;  %s5165_s27 = sld [smem:[#allocation4_spill]] }
 0xaf0   : > { %v2439_v54 = vmul.f32 %v4340_v21, %v4334_v2  ;;  %4156 = vmatprep.subr.mxu0 %v4383_v18 }
 0xaf2   : > { %4130 = vmatmul.mubr.msk.f32.gmra.mxu0 %vm1528_vm6, %v2439_v54 }
 0xaf3   : > { %4144 = vmatprep.mubr.msk.bf16.mxu0 %vm1149_vm3, %v4684_v16  ;;  %v3800_v16 = vld [vmem:[%s4555_s30 + $0x3] ss:$0 sm:$0xff]  ;;  %s4387_s30 = smov 24  }
 0xaf5   : > { %p3845_p5 = scmp.ne.s32.totalorder %s5165_s27, 1 }
 0xaf6   : > { %4145 = vmatmul.mubr.msk.bf16.vlgmr.msra.gmra.mxu0 %vm1149_vm3, %v4682_v15  ;;  %s5166_s25 = sld [smem:[#allocation21_spill]] (!%p3845_p5) }
 0xaf7   : > { %4162 = vmatprep.mubr.msk.f32.mxu0 %vm4384_vm4, %v4383_v18  ;;  %s5168_s5 = sld [smem:[#allocation23_spill]] (!%p3845_p5) }
 0xafd   : > { %s5169_s24 = smov (!%p3845_p5), %s5168_s5 }
 0xbaa   : > { %v4938_v22 = vpop.f32.mrf.mxu0 }
 0xbac   : > { %v4125_v53 = vpop.f32.mrf.mxu0 }
 0xbae   : > { %v4940_v0 = vpop.f32.mrf.mxu0 }
 0xbaf   : > { %v4253_v23 = vpack.i.bf16 %v4940_v0, %v4938_v22 }
 0xbb0   : > { %v4128_v24 = vpop.f32.mrf.mxu0 }
 0xbb2   : > { %v4944_v25 = vpop.f32.mrf.mxu0 }
 0xbb4   : > { %v4131_v26 = vpop.f32.mrf.mxu0 }
 0xbb6   : > { %v4146_v27 = vpop.f32.mrf.mxu0 }
 0xbb7   : > { %v2670_v28 = vadd.f32 %v4146_v27, %v3800_v16 }
 0xbb8   : > { %v2661_v15 = vpop.f32.mrf.mxu0 }
 0xbb9   : > { %4157 = vmatpush3.xpose.msk.msra.mxu0 %vm1429_vm5, %v2670_v28  ;;  %v2662_v32 = vadd.f32 %v3800_v16, %v2661_v15 }
 0xbba   : > { %v4147_v29 = vpop.f32.mrf.mxu0  ;;  %4158 = vmatprep.subr.mxu0 %v4383_v18 }
 0xbbc   : > { %v2664_v30 = vpop.f32.mrf.mxu0 }
 0xbbd   : > { %v2665_v31 = vadd.f32 %v3800_v16, %v2664_v30 }
 0xbbf   : > { %4159 = vmatpush3.xpose.msk.msra.mxu0 %vm1429_vm5, %v2665_v31 }
 0xbc0   : > { %4160 = vmatprep.subr.mxu0 %v4383_v18 }
 0xbc3   : > { %4161 = vmatpush3.xpose.msk.msra.mxu0 %vm1429_vm5, %v2662_v32 }
 0xbc4   : > { %4186 = vmatprep.subr.bf16.mxu0 %v4287_v62 }
 0xbc6   : > { %4163 = vmatmul.mubr.msk.f32.vlgmr.msra.gmra.mxu0 %vm1429_vm5, %v2589_v37 }
 0xbc7   : > { %4165 = vmatprep.mubr.msk.f32.mxu0 %vm4384_vm4, %v4383_v18  ;;  %4187 = vmatpush3.bf16.msra.mxu0 %v4287_v62  ;;  %v4289_v62 = vld [vmem:[%s4588_s13 + $0x8] sm:$0xff]  }
 0xbc8   : > { %4188 = vmatprep.subr.bf16.mxu0 %v4288_v19  ;;  %4194 = vmatprep.subr.bf16.mxu1 %v4289_v62 }
 0xbca   : > { %4166 = vmatmul.mubr.msk.f32.gmra.mxu0 %vm1429_vm5, %v2592_v39 }
 0xbcb   : > { %4168 = vmatprep.mubr.msk.f32.mxu0 %vm4384_vm4, %v4383_v18  ;;  %4189 = vmatpush3.bf16.msra.mxu0 %v4288_v19  ;;  %v4290_v19 = vld [vmem:[%s4588_s13] sm:$0xff]  }
 0xbce   : > { %4169 = vmatmul.mubr.msk.f32.gmra.mxu0 %vm1429_vm5, %v2597_v41 }
 0xc86   : > { %v2832_v43 = vpop.f32.mrf.mxu0 }
 0xc87   : > { %v2833_v44 = vadd.f32 %v2832_v43, %v4740_v47 }
 0xc88   : > { %v4164_v34 = vpop.f32.mrf.mxu0 }
 0xc89   : > { %v2846_v45 = vsel %vm1528_vm6, %v2833_v44, -inf }
 0xc8a   : > { %2847 = vmax.xlane.f32.xlu0 %v2846_v45  ;;  %v2837_v46 = vpop.f32.mrf.mxu0 }
 0xc8b   : > { %v2838_v48 = vadd.f32 %v2837_v46, %v4746_v51 }
 0xc8c   : > { %v4167_v36 = vpop.f32.mrf.mxu0 }
 0xc8d   : > { %v2849_v49 = vsel %vm1528_vm6, %v2838_v48, -inf  ;;  %v4365_v36 = vld [vmem:[#allocation2 + $0x10] sm:$0xff] }
 0xc8e   : > { %2850 = vmax.xlane.f32.xlu1 %v2849_v49  ;;  %v2842_v50 = vpop.f32.mrf.mxu0 }
 0xc8f   : > { %v2843_v52 = vadd.f32 %v2842_v50, %v4753_v56  ;;  %v4366_v50 = vld [vmem:[#allocation2] sm:$0xff] }
 0xc90   : > { %v4170_v33 = vpop.f32.mrf.mxu0 }
 0xc91   : > { %v2852_v55 = vsel %vm1528_vm6, %v2843_v52, -inf  ;;  %v3828_v33 = vld [vmem:[%s5163_s0] ss:$0 sm:$0xff] }
 0xc92   : > { %2853 = vmax.xlane.f32.xlu0 %v2852_v55 }
 0xd13   : > { %v2848_v57 = vpop.xlane.xlu0 %2847 }
 0xd14   : > { %v2855_v47 = vsub.f32 %v2833_v44, %v2848_v57 }
 0xd16   : > { %v2858_v58 = vmul.f32 1.442695, %v2855_v47 }
 0xd17   : > { %v2851_v59 = vpop.xlane.xlu1 %2850 }
 0xd18   : > { %4341 = vpow2.f32 %v2858_v58  ;;  %v2856_v60 = vsub.f32 %v2838_v48, %v2851_v59  ;;  %v4367_v59 = vld [vmem:[#allocation2 + $0x8] sm:$0xff] }
 0xd1a   : > { %v2860_v4 = vmul.f32 1.442695, %v2856_v60 }
 0xd1b   : > { %v2854_v7 = vpop.xlane.xlu0 %2853 }
 0xd1c   : > { %4343 = vpow2.f32 %v2860_v4  ;;  %v2857_v51 = vsub.f32 %v2843_v52, %v2854_v7 }
 0xd1e   : > { %v2862_v9 = vmul.f32 1.442695, %v2857_v51 }
 0xd20   : > { %4345 = vpow2.f32 %v2862_v9 }
 0xd25   : > { %v4342_v63 = vpop.eup %4341 }
 0xd26   : > { %v2864_v10 = vsel %vm1528_vm6, %v4342_v63, 0.0 }
 0xd27   : > { %2865 = vadd.xlane.f32.xlu1 %v2864_v10 }
 0xd29   : > { %v4344_v56 = vpop.eup %4343 }
 0xd2a   : > { %v2867_v2 = vsel %vm1528_vm6, %v4344_v56, 0.0 }
 0xd2b   : > { %2868 = vadd.xlane.f32.xlu0 %v2867_v2 }
 0xd2d   : > { %v4346_v11 = vpop.eup %4345 }
 0xd2e   : > { %v2870_v12 = vsel %vm1528_vm6, %v4346_v11, 0.0 }
 0xd2f   : > { %2871 = vadd.xlane.f32.xlu1 %v2870_v12 }
 0xd40   : > { %2975 = vrot.lane.b32.xlu1 %v4870_v8, %s4385_s29 }
 0xd41   : > { %4249 = vrot.lane.b32.xlu0 %v4248_v6, %s4385_s29  ;;  %s5167_s29 = sld [smem:[#allocation22_spill]] (!%p3845_p5) }
 0xd44   : > { %4254 = vrot.lane.b32.xlu1 %v4253_v23, %s4386_s28 }
 0xd48   : > { %2987 = vrot.lane.b32.xlu1 %v4944_v25, %s4386_s28 }
 0xdb0   : > { %v2866_v1 = vpop.xlane.xlu1 %2865 }
 0xdb1   : > { %4347 = vrcp.f32 %v2866_v1 }
 0xdb4   : > { %v2869_v3 = vpop.xlane.xlu0 %2868 }
 0xdb5   : > { %4349 = vrcp.f32 %v2869_v3 }
 0xdb8   : > { %v2872_v13 = vpop.xlane.xlu1 %2871  ;;  %v4250_v25 = vpop.permute.xlu0 %4249 }
 0xdb9   : > { %4351 = vrcp.f32 %v2872_v13  ;;  %v4252_v26 = vunpack.i.h.bf16 %v4250_v25  ;;  %v4251_v16 = vunpack.i.l.bf16 %v4250_v25 }
 0xdbb   : > { %v3005_v29 = vsel %vm1429_vm5, %v4801_v40, %v4252_v26  ;;  %v3004_v31 = vsel %vm1429_vm5, %v4799_v38, %v4251_v16  ;;  %v3829_v16 = vld [vmem:[%s5164_s11] ss:$0 sm:$0xff] }
 0xdbe   : > { %v4348_v8 = vpop.eup %4347 }
 0xdbf   : > { %v2876_v14 = vmul.f32 %v4348_v8, %v4342_v63 }
 0xdc1   : > { %4178 = vmatmul.mubr.msk.f32.vlgmr.msra.gmra.mxu1 %vm1528_vm6, %v2876_v14 }
 0xdc2   : > { %v4350_v61 = vpop.eup %4349  ;;  %4180 = vmatprep.mubr.msk.f32.mxu1 %vm4384_vm4, %v4383_v18  ;;  %4195 = vmatpush3.bf16.msra.mxu1 %v4289_v62 }
 0xdc3   : > { %v2877_v5 = vmul.f32 %v4350_v61, %v4344_v56  ;;  %4196 = vmatprep.subr.bf16.mxu1 %v4290_v19 }
 0xdc5   : > { %4181 = vmatmul.mubr.msk.f32.gmra.mxu1 %vm1528_vm6, %v2877_v5 }
 0xdc6   : > { %v4352_v6 = vpop.eup %4351  ;;  %4183 = vmatprep.mubr.msk.f32.mxu1 %vm4384_vm4, %v4383_v18  ;;  %v2976_v18 = vpop.permute.xlu1 %2975  ;;  %4197 = vmatpush3.bf16.msra.mxu1 %v4290_v19 }
 0xdc7   : > { %v2878_v17 = vmul.f32 %v4352_v6, %v4346_v11  ;;  %v3006_v32 = vsel %vm1429_vm5, %v4803_v42, %v2976_v18 }
 0xdc9   : > { %4184 = vmatmul.mubr.msk.f32.gmra.mxu1 %vm1528_vm6, %v2878_v17 }
 0xdca   : > { %v4255_v24 = vpop.permute.xlu1 %4254 }
 0xdcb   : > { %v4257_v27 = vunpack.i.h.bf16 %v4255_v24  ;;  %v4256_v28 = vunpack.i.l.bf16 %v4255_v24 }
 0xdcd   : > { %v3008_v39 = vsel %vm3007_vm7, %v3004_v31, %v4256_v28  ;;  %v3009_v41 = vsel %vm3007_vm7, %v3005_v29, %v4257_v27  ;;  %v3830_v31 = vld [vmem:[%s955_s4] ss:$0 sm:$0xff] }
 0xdce   : > { %v2988_v15 = vpop.permute.xlu1 %2987 }
 0xdcf   : > { %v3010_v43 = vsel %vm3007_vm7, %v3006_v32, %v2988_v15 }
 0xe81   : > { %v2954_v20 = vpop.f32.mrf.mxu1 }
 0xe83   : > { %v4179_v21 = vpop.f32.mrf.mxu1 }
 0xe85   : > { %v2959_v54 = vpop.f32.mrf.mxu1 }
 0xe86   : > { %v4258_v22 = vpack.i.bf16 %v2959_v54, %v2954_v20 }
 0xe87   : > { %v4182_v53 = vpop.f32.mrf.mxu1 }
 0xe88   : > { %4259 = vrot.lane.b32.xlu0 %v4258_v22, %s4387_s30 }
 0xe89   : > { %v2964_v0 = vpop.f32.mrf.mxu1 }
 0xe8a   : > { %2999 = vrot.lane.b32.xlu1 %v2964_v0, %s4387_s30 }
 0xe8b   : > { %v4185_v23 = vpop.f32.mrf.mxu1 }
 0xefa   : > { %v4260_v30 = vpop.permute.xlu0 %4259 }
 0xefb   : > { %v4262_v35 = vunpack.i.h.bf16 %v4260_v30  ;;  %v4261_v37 = vunpack.i.l.bf16 %v4260_v30 }
 0xefc   : > { %v3000_v44 = vpop.permute.xlu1 %2999 }
 0xefd   : > { %v3011_v34 = vsel %vm1528_vm6, %v3008_v39, %v4261_v37  ;;  %v3012_v45 = vsel %vm1528_vm6, %v3009_v41, %v4262_v35  ;;  %v3013_v40 = vsel %vm1528_vm6, %v3010_v43, %v3000_v44 }
 0xefe   : > { %v3014_v46 = vpack.c.bf16 %v3012_v45, %v3011_v34  ;;  %v3015_v48 = vpack.c.bf16 %v3013_v40, %v3013_v40  ;;  %v4291_v34 = vld [vmem:[%s4597_s14 + $0x38] sm:$0xff]   ;;  %v4292_v45 = vld [vmem:[%s4597_s14 + $0x30] sm:$0xff]   ;;  %v4293_v40 = vld [vmem:[%s4597_s14 + $0x28] sm:$0xff]  }
 0xeff   : > { %4202 = vmatprep.subr.bf16.mxu0 %v4291_v34 }
 0xf00   : > { %4190 = vmatprep.mubr.msk.bf16.mxu0 %vm1149_vm3, %v3014_v46  ;;  %v4294_v46 = vld [vmem:[%s4597_s14 + $0x20] sm:$0xff]  }
 0xf01   : > { %4191 = vmatmul.mubr.msk.bf16.vlgmr.msra.gmra.mxu0 %vm1149_vm3, %v3015_v48  ;;  %v4295_v48 = vld [vmem:[%s4597_s14 + $0x18] sm:$0xff]  }
 0xf02   : > { %4203 = vmatpush3.bf16.msra.mxu0 %v4291_v34 }
 0xf03   : > { %4204 = vmatprep.subr.bf16.mxu0 %v4292_v45 }
 0xf06   : > { %4205 = vmatpush3.bf16.msra.mxu0 %v4292_v45 }
 0xf07   : > { %4206 = vmatprep.subr.bf16.mxu0 %v4293_v40 }
 0xf0a   : > { %4207 = vmatpush3.bf16.msra.mxu0 %v4293_v40 }
 0xf0b   : > { %4208 = vmatprep.subr.bf16.mxu0 %v4294_v46 }
 0xf0e   : > { %4209 = vmatpush3.bf16.msra.mxu0 %v4294_v46 }
 0xf0f   : > { %4210 = vmatprep.subr.bf16.mxu0 %v4295_v48 }
 0xf12   : > { %4211 = vmatpush3.bf16.msra.mxu0 %v4295_v48 }
 0xfc1   : > { %v4192_v38 = vpop.f32.mrf.mxu0 }
 0xfc2   : > { %v3088_v49 = vadd.f32 %v4365_v36, %v4192_v38  ;;  %v4296_v38 = vld [vmem:[%s4597_s14 + $0x10] sm:$0xff]   ;;  %v4298_v36 = vld [vmem:[%s4597_s14] sm:$0xff]  }
 0xfc3   : > { %v3072_v42 = vpop.f32.mrf.mxu0  ;;  %4212 = vmatprep.subr.bf16.mxu0 %v4296_v38 }
 0xfc4   : > { %v3086_v52 = vadd.f32 %v4366_v50, %v3072_v42  ;;  %v5007_v58 = vadd.f32 %v3828_v33, %v3088_v49  ;;  %v4297_v42 = vld [vmem:[%s4597_s14 + $0x8] sm:$0xff]   ;;  %4213 = vmatpush3.bf16.msra.mxu0 %v4296_v38  ;;  %v3831_v49 = vld [vmem:[%s963_s2] ss:$0 sm:$0xff] }
 0xfc5   : > { %v4193_v55 = vpop.f32.mrf.mxu0  ;;  %4214 = vmatprep.subr.bf16.mxu0 %v4297_v42 }
 0xfc6   : > { %v5005_v57 = vadd.f32 %v3828_v33, %v3086_v52  ;;  %v3107_v51 = vsel %vm1149_vm3, %v5007_v58, 0.0 }
 0xfc7   : > { %v3075_v47 = vpop.f32.mrf.mxu0 }
 0xfc8   : > { %v3087_v60 = vadd.f32 %v4367_v59, %v3075_v47  ;;  %v3101_v4 = vsel %vm1149_vm3, %v5005_v57, 0.0  ;;  %4215 = vmatpush3.bf16.msra.mxu0 %v4297_v42 }
 0xfc9   : > { %3102 = vadd.xlane.f32.xlu0 %v3101_v4  ;;  %4216 = vmatprep.subr.bf16.mxu0 %v4298_v36 }
 0xfca   : > { %v5011_v7 = vadd.f32 %v3828_v33, %v3087_v60 }
 0xfcc   : > { %v3104_v9 = vsel %vm1149_vm3, %v5011_v7, 0.0  ;;  %4217 = vmatpush3.bf16.msra.mxu0 %v4298_v36 }
 0xfcd   : > { %3108 = vadd.xlane.f32.xlu0 %v3107_v51  ;;  %3105 = vadd.xlane.f32.xlu1 %v3104_v9 }
0x1052   : > { %v3103_v63 = vpop.xlane.xlu0 %3102 }
0x1053   : > { %v3110_v10 = vmul.f32 0.03125, %v3103_v63 }
0x1055   : > { %v3113_v56 = vsub.f32 %v5005_v57, %v3110_v10 }
0x1056   : > { %v3109_v2 = vpop.xlane.xlu0 %3108  ;;  %v3106_v11 = vpop.xlane.xlu1 %3105 }
0x1057   : > { %v3112_v12 = vmul.f32 0.03125, %v3109_v2  ;;  %v3111_v1 = vmul.f32 0.03125, %v3106_v11  ;;  %v3116_v3 = vmul.f32 %v3113_v56, %v3113_v56 }
0x1059   : > { %v3115_v13 = vsub.f32 %v5007_v58, %v3112_v12  ;;  %v3114_v8 = vsub.f32 %v5011_v7, %v3111_v1  ;;  %v3119_v14 = vsel %vm1149_vm3, %v3116_v3, 0.0 }
0x105a   : > { %3120 = vadd.xlane.f32.xlu0 %v3119_v14 }
0x105b   : > { %v3118_v61 = vmul.f32 %v3115_v13, %v3115_v13  ;;  %v3117_v5 = vmul.f32 %v3114_v8, %v3114_v8 }
0x105d   : > { %v3125_v6 = vsel %vm1149_vm3, %v3118_v61, 0.0  ;;  %v3122_v17 = vsel %vm1149_vm3, %v3117_v5, 0.0 }
0x105e   : > { %3126 = vadd.xlane.f32.xlu1 %v3125_v6  ;;  %3123 = vadd.xlane.f32.xlu0 %v3122_v17 }
0x10e3   : > { %v3121_v20 = vpop.xlane.xlu0 %3120 }
0x10e4   : > { %v3128_v21 = vmul.f32 0.03125, %v3121_v20 }
0x10e6   : > { %v3131_v54 = vadd.f32 1e-06, %v3128_v21 }
0x10e7   : > { %v3124_v22 = vpop.xlane.xlu0 %3123  ;;  %v3127_v53 = vpop.xlane.xlu1 %3126 }
0x10e8   : > { %4353 = vrsqrt.f32 %v3131_v54  ;;  %v3129_v0 = vmul.f32 0.03125, %v3124_v22  ;;  %v3130_v23 = vmul.f32 0.03125, %v3127_v53 }
0x10ea   : > { %v3132_v18 = vadd.f32 1e-06, %v3129_v0  ;;  %v3133_v24 = vadd.f32 1e-06, %v3130_v23 }
0x10ec   : > { %4355 = vrsqrt.f32 %v3132_v18 }
0x10ed   : > { %4357 = vrsqrt.f32 %v3133_v24 }
0x10f5   : > { %v4354_v25 = vpop.eup %4353 }
0x10f6   : > { %v3137_v26 = vmul.f32 %v4354_v25, %v3113_v56 }
0x10f8   : > { %v3146_v29 = vmul.f32 %v3829_v16, %v3137_v26  ;;  %v3844_v26 = vld [vmem:[%s971_s26] ss:$0 sm:$0xff] }
0x10f9   : > { %v4356_v27 = vpop.eup %4355 }
0x10fa   : > { %v4358_v28 = vpop.eup %4357  ;;  %v3138_v15 = vmul.f32 %v4356_v27, %v3114_v8  ;;  %v3155_v37 = vadd.f32 %v3830_v31, %v3146_v29 }
0x10fb   : > { %v3139_v30 = vmul.f32 %v4358_v28, %v3115_v13 }
0x10fc   : > { %v3147_v32 = vmul.f32 %v3829_v16, %v3138_v15 }
0x10fd   : > { %v3148_v35 = vmul.f32 %v3829_v16, %v3139_v30 }
0x10fe   : > { %v3156_v39 = vadd.f32 %v3830_v31, %v3147_v32 }
0x10ff   : > { %v3157_v41 = vadd.f32 %v3830_v31, %v3148_v35 }
0x1100   : > { %v3158_v43 = vpack.c.bf16 %v3156_v39, %v3155_v37 }
0x1101   : > { %v3159_v44 = vpack.c.bf16 %v3157_v41, %v3157_v41 }
0x1102   : > { %4198 = vmatprep.mubr.msk.bf16.mxu1 %vm1149_vm3, %v3158_v43 }
0x1103   : > { %4199 = vmatmul.mubr.msk.bf16.vlgmr.msra.gmra.mxu1 %vm1149_vm3, %v3159_v44 }
0x11c3   : > { %v4200_v50 = vpop.f32.mrf.mxu1 }
0x11c4   : > { %v3232_v52 = vadd.f32 %v4200_v50, %v3831_v49 }
0x11c5   : > { %v3223_v33 = vpop.f32.mrf.mxu1 }
0x11c6   : > { %v3242_v55 = vmul.f32 0.044715, %v3232_v52  ;;  %v3224_v47 = vadd.f32 %v3831_v49, %v3223_v33  ;;  %v3239_v20 = vmul.f32 0.5, %v3232_v52 }
0x11c7   : > { %v4201_v59 = vpop.f32.mrf.mxu1 }
0x11c8   : > { %v3245_v60 = vmul.f32 %v3242_v55, %v3232_v52  ;;  %v3240_v4 = vmul.f32 0.044715, %v3224_v47  ;;  %v3237_v21 = vmul.f32 0.5, %v3224_v47 }
0x11c9   : > { %v3226_v51 = vpop.f32.mrf.mxu1 }
0x11ca   : > { %v3248_v9 = vmul.f32 %v3245_v60, %v3232_v52  ;;  %v3243_v63 = vmul.f32 %v3240_v4, %v3224_v47  ;;  %v3227_v10 = vadd.f32 %v3831_v49, %v3226_v51 }
0x11cc   : > { %v3251_v56 = vadd.f32 %v3248_v9, %v3232_v52  ;;  %v3246_v2 = vmul.f32 %v3243_v63, %v3224_v47  ;;  %v3241_v11 = vmul.f32 0.044715, %v3227_v10  ;;  %v3238_v54 = vmul.f32 0.5, %v3227_v10 }
0x11ce   : > { %v3254_v12 = vmul.f32 0.7978846, %v3251_v56  ;;  %v3244_v1 = vmul.f32 %v3241_v11, %v3227_v10  ;;  %v3249_v3 = vadd.f32 %v3246_v2, %v3224_v47 }
0x11d0   : > { %v3247_v13 = vmul.f32 %v3244_v1, %v3227_v10  ;;  %v3252_v8 = vmul.f32 0.7978846, %v3249_v3  ;;  %4359 = vtanh.f32 %v3254_v12 }
0x11d2   : > { %v3250_v14 = vadd.f32 %v3247_v13, %v3227_v10  ;;  %4361 = vtanh.f32 %v3252_v8 }
0x11d4   : > { %v3253_v61 = vmul.f32 0.7978846, %v3250_v14 }
0x11d6   : > { %4363 = vtanh.f32 %v3253_v61 }
0x11dd   : > { %v4360_v5 = vpop.eup %4359 }
0x11de   : > { %v3260_v17 = vadd.f32 1.0, %v4360_v5 }
0x11df   : > { %v4362_v6 = vpop.eup %4361 }
0x11e0   : > { %v3258_v62 = vadd.f32 1.0, %v4362_v6  ;;  %v3263_v53 = vmul.f32 %v3260_v17, %v3239_v20 }
0x11e2   : > { %v3261_v0 = vmul.f32 %v3258_v62, %v3237_v21  ;;  %v3265_v24 = vpack.c.bf16 %v3263_v53, %v3263_v53 }
0x11e3   : > { %v4364_v19 = vpop.eup %4363 }
0x11e4   : > { %v3259_v22 = vadd.f32 1.0, %v4364_v19 }
0x11e6   : > { %v3262_v23 = vmul.f32 %v3259_v22, %v3238_v54 }
0x11e8   : > { %v3264_v18 = vpack.c.bf16 %v3262_v23, %v3261_v0 }
0x11ea   : > { %4218 = vmatprep.mubr.bf16.mxu0 %v3264_v18 }
0x11eb   : > { %4219 = vmatmul.mubr.bf16.vlgmr.msra.gmra.mxu0 %v3265_v24 }
0x12ab   : > { %v4220_v25 = vpop.f32.mrf.mxu0 }
0x12ac   : > { %v3380_v16 = vadd.f32 %v4220_v25, %v5007_v58 }
0x12ad   : > { %v3364_v27 = vpop.f32.mrf.mxu0 }
0x12ae   : > { %v3390_v28 = vadd.f32 %v3844_v26, %v3380_v16  ;;  %v3378_v15 = vadd.f32 %v3364_v27, %v5005_v57 }
0x12af   : > { %v4221_v29 = vpop.f32.mrf.mxu0 }
0x12b0   : > { %3393 = vst.msk [vmem:[#allocation2 + $0x10] sm:$0xff] %vm1149_vm3, %v3390_v28  ;;  %v3388_v30 = vadd.f32 %v3844_v26, %v3378_v15 }
0x12b1   : > { %v3367_v31 = vpop.f32.mrf.mxu0 }
0x12b2   : > { %3391 = vst.msk [vmem:[#allocation2] sm:$0xff] %vm1149_vm3, %v3388_v30  ;;  %v3379_v32 = vadd.f32 %v3367_v31, %v5011_v7  ;;  %3397 = sbr.rel (%p3845_p5) target bundleno = 5105 (0x13f1), region = 124 }
0x12b4   : > { %v3389_v35 = vadd.f32 %v3844_v26, %v3379_v32 }
0x12b6   : > { %3392 = vst.msk [vmem:[#allocation2 + $0x8] sm:$0xff] %vm1149_vm3, %v3389_v35 }
0x12b7   : > { %v3400_v58 = vsel %vm1149_vm3, %v3388_v30, 0.0  ;;  %v3406_v37 = vsel %vm1149_vm3, %v3390_v28, 0.0  ;;  %v3403_v57 = vsel %vm1149_vm3, %v3389_v35, 0.0  ;;  %v3846_v10 = vld [vmem:[%s5166_s25] ss:$0 sm:$0xff] }
0x12b8   : > { %3401 = vadd.xlane.f32.xlu0 %v3400_v58  ;;  %3407 = vadd.xlane.f32.xlu1 %v3406_v37  ;;  %v3847_v2 = vld [vmem:[%s5167_s29] ss:$0 sm:$0xff] }
0x12bc   : > { %3404 = vadd.xlane.f32.xlu0 %v3403_v57 }
0x1341   : > { %v3402_v39 = vpop.xlane.xlu0 %3401  ;;  %v3408_v41 = vpop.xlane.xlu1 %3407 }
0x1342   : > { %v3409_v43 = vmul.f32 0.03125, %v3402_v39  ;;  %v3411_v44 = vmul.f32 0.03125, %v3408_v41 }
0x1344   : > { %v3412_v7 = vsub.f32 %v3388_v30, %v3409_v43  ;;  %v3414_v34 = vsub.f32 %v3390_v28, %v3411_v44 }
0x1345   : > { %v3405_v45 = vpop.xlane.xlu0 %3404 }
0x1346   : > { %v3410_v40 = vmul.f32 0.03125, %v3405_v45  ;;  %v3415_v46 = vmul.f32 %v3412_v7, %v3412_v7  ;;  %v3417_v48 = vmul.f32 %v3414_v34, %v3414_v34 }
0x1348   : > { %v3413_v38 = vsub.f32 %v3389_v35, %v3410_v40  ;;  %v3418_v42 = vsel %vm1149_vm3, %v3415_v46, 0.0  ;;  %v3424_v36 = vsel %vm1149_vm3, %v3417_v48, 0.0 }
0x1349   : > { %3419 = vadd.xlane.f32.xlu1 %v3418_v42 }
0x134a   : > { %v3416_v49 = vmul.f32 %v3413_v38, %v3413_v38 }
0x134c   : > { %v3421_v50 = vsel %vm1149_vm3, %v3416_v49, 0.0 }
0x134d   : > { %3425 = vadd.xlane.f32.xlu1 %v3424_v36  ;;  %3422 = vadd.xlane.f32.xlu0 %v3421_v50 }
0x13d2   : > { %v3420_v52 = vpop.xlane.xlu1 %3419 }
0x13d3   : > { %v3427_v33 = vmul.f32 0.03125, %v3420_v52 }
0x13d5   : > { %v3430_v55 = vadd.f32 1e-06, %v3427_v33 }
0x13d6   : > { %v3426_v47 = vpop.xlane.xlu1 %3425  ;;  %v3423_v59 = vpop.xlane.xlu0 %3422 }
0x13d7   : > { %4368 = vrsqrt.f32 %v3430_v55  ;;  %v3429_v60 = vmul.f32 0.03125, %v3426_v47  ;;  %v3428_v4 = vmul.f32 0.03125, %v3423_v59 }
0x13d9   : > { %v3432_v51 = vadd.f32 1e-06, %v3429_v60  ;;  %v3431_v9 = vadd.f32 1e-06, %v3428_v4 }
0x13db   : > { %4370 = vrsqrt.f32 %v3432_v51 }
0x13dc   : > { %4372 = vrsqrt.f32 %v3431_v9 }
0x13e4   : > { %v4369_v63 = vpop.eup %4368 }
0x13e5   : > { %v3436_v56 = vmul.f32 %v4369_v63, %v3412_v7 }
0x13e7   : > { %v3445_v11 = vmul.f32 %v3846_v10, %v3436_v56 }
0x13e8   : > { %v4371_v12 = vpop.eup %4370 }
0x13e9   : > { %v4373_v1 = vpop.eup %4372  ;;  %v3454_v3 = vadd.f32 %v3847_v2, %v3445_v11  ;;  %v3438_v13 = vmul.f32 %v4371_v12, %v3414_v34 }
0x13ea   : > { %v3437_v8 = vmul.f32 %v4373_v1, %v3413_v38 }
0x13eb   : > { %3457 = vst.msk [vmem:[%s5168_s5] sm:$0xff] %vm1149_vm3, %v3454_v3  ;;  %v3447_v14 = vmul.f32 %v3846_v10, %v3438_v13 }
0x13ec   : > { %v3446_v61 = vmul.f32 %v3846_v10, %v3437_v8 }
0x13ed   : > { %v3456_v5 = vadd.f32 %v3847_v2, %v3447_v14 }
0x13ee   : > { %v3455_v6 = vadd.f32 %v3847_v2, %v3446_v61 }
0x13ef   : > { %3459 = vst.msk [vmem:[%s5169_s24 + $0x10] sm:$0xff] %vm1149_vm3, %v3456_v5 }
0x13f0   : > { %3458 = vst.msk [vmem:[%s5169_s24 + $0x8] sm:$0xff] %vm1149_vm3, %v3455_v6 }
0x13f1 PF: > { %s5170_s7 = sld [smem:[#allocation3_spill]] }
0x13f7   : > { %s34_s5 = sadd.s32 1, %s5170_s7  }
0x13f8   : > { %p31_p6 = scmp.ge.s32.totalorder %s34_s5, 4  }
0x13fa   :  { %33 = sbr.rel (!%p31_p6) target bundleno = 19 (0x13), region = 213 }

</bundles_post_ra>
